<compile_context>
chip_gen: v7x
topology: tpu7x:2x2x1
jax: 0.10.0
libtpu: 0.0.40
codegen_flags: <defaults>
</compile_context>

<pallas_src>
import functools

import jax
import jax.numpy as jnp
import numpy as np
from jax.experimental import pallas as pl
from jax.experimental.pallas import tpu as pltpu

# ---- model hyper-params (mirrors ModifiedCNN.__init__) ----
C_IN = 1          # input_channels
C1 = 32           # conv1 out channels
C2 = 64           # conv2 out channels
HID = 256         # fc1 out features
OUT = 3           # output_size
OUT_PAD = 128     # lane-dense fc2 output width (sliced back to OUT host-side)
K_TAPS = 8        # conv1 im2col taps (3 real taps, zero-padded to a sublane tile)
BN_EPS = 1e-5


# ----------------------------- Pallas kernel -----------------------------
def _cnn_kernel(x3_ref, w1_ref, sh1_ref, w2_ref, sh2_ref,
                wfc1_ref, bfc1_ref, wfc2_ref, bfc2_ref,
                out_ref, p1_s, s2_s, *, TB, L2, G, NG):
    HALF = L2 * TB

    # ---- conv1 (k=3, pad=1; BN scale folded into w1) + shift + ReLU ---------
    # Input rows are pool1-parity-major (all even positions, then all odd), each
    # l-major (row = l2*TB + b); taps were gathered host-side (im2col), so the
    # conv is one MXU dot per half and pool1 is a plain elementwise max.
    w1 = w1_ref[...]
    sh1 = sh1_ref[...]
    y1e = jnp.maximum(jnp.dot(x3_ref[pl.ds(0, HALF), :], w1,
                              preferred_element_type=jnp.float32) + sh1, 0.0)
    y1o = jnp.maximum(jnp.dot(x3_ref[pl.ds(HALF, HALF), :], w1,
                              preferred_element_type=jnp.float32) + sh1, 0.0)

    # ---- maxpool1 -> zero-haloed bf16 scratch (halo rows = conv2 padding) ----
    p1_s[pl.ds(0, TB), :] = jnp.zeros((TB, C1), jnp.bfloat16)
    p1_s[pl.ds((L2 + 1) * TB, TB), :] = jnp.zeros((TB, C1), jnp.bfloat16)
    p1_s[pl.ds(TB, HALF), :] = jnp.maximum(y1e, y1o).astype(jnp.bfloat16)

    # ---- conv2 (k=3, pad=1; BN scale folded into w2) as 3 accumulating dots --
    # Tap views are contiguous, TB-aligned row windows of the haloed scratch.
    y2 = (jnp.dot(p1_s[pl.ds(0, HALF), :], w2_ref[0],
                  preferred_element_type=jnp.float32)
          + jnp.dot(p1_s[pl.ds(TB, HALF), :], w2_ref[1],
                    preferred_element_type=jnp.float32)
          + jnp.dot(p1_s[pl.ds(2 * TB, HALF), :], w2_ref[2],
                    preferred_element_type=jnp.float32))
    s2_s[...] = jnp.maximum(y2 + sh2_ref[...], 0.0).astype(jnp.bfloat16)

    # ---- maxpool2 fused into the K-grouped fc1 contraction -------------------
    # Group G pooled positions: lane-concat into a (TB, G*C2) tile and contract
    # against the pre-interleaved (G*C2, HID) weight block (PyTorch flatten order
    # c*L4 + l is folded into wfc1 host-side).
    def fc1_group(grp, acc):
        base = grp * (2 * G * TB)
        if not isinstance(base, int):
            base = pl.multiple_of(base, TB)
        tiles = []
        for t in range(G):
            r = base + 2 * t * TB
            tiles.append(jnp.maximum(s2_s[pl.ds(r, TB), :],
                                     s2_s[pl.ds(r + TB, TB), :]))   # (TB, C2) bf16
        ag = tiles[0] if G == 1 else jnp.concatenate(tiles, axis=-1)
        return acc + jnp.dot(ag, wfc1_ref[grp],
                             preferred_element_type=jnp.float32)

    acc = jnp.zeros((TB, HID), jnp.float32)
    if NG <= 8:                        # short sequences: full unroll (LLO visibility)
        for grp in range(NG):
            acc = fc1_group(grp, acc)
    else:                              # long sequences: bounded live ranges
        acc = jax.lax.fori_loop(0, NG, fc1_group, acc)

    z1 = jnp.maximum(acc + bfc1_ref[...], 0.0)                       # (TB, HID)
    # Dropout(p=0.2) is the identity in eval/inference mode.
    # TODO(synk): train-mode dropout (RNG mask + 1/(1-p) scale) not implemented.
    out_ref[...] = (jnp.dot(z1.astype(jnp.bfloat16), wfc2_ref[...],
                            preferred_element_type=jnp.float32) + bfc2_ref[...])


# ----------------------------- wrapper (glue) -----------------------------
def _choose_tb(B, L):
    """Rows per batch block: big MXU M, bounded input VMEM, >=2 grid steps when
    the batch allows it (v7x megacore)."""
    tb = 128
    while tb > 8 and L * tb > 16384:   # cap the lane-padded (L*TB, K) input block
        tb //= 2
    b8 = -(-B // 8) * 8                # batch rounded up to a sublane tile
    if b8 < 16:
        return 8
    if b8 <= 2 * tb:                   # small batch: split into exactly 2 blocks
        return -(-(b8 // 2) // 8) * 8
    return tb


def modified_cnn_forward(x_ncl, p):
    """x_ncl: (B, C_IN, L) float32, PyTorch NCL layout."""
    B, Cin, L = x_ncl.shape
    assert Cin == C_IN
    # TODO(synk): PyTorch MaxPool1d floors odd lengths (e.g. seq 255); this kernel
    # requires L % 4 == 0 (pad/crop host-side for other lengths).
    assert L % 4 == 0, "sequence length must be a multiple of 4"
    L2, L4 = L // 2, L // 4
    G = 4 if L4 % 4 == 0 else (2 if L4 % 2 == 0 else 1)
    NG = L4 // G
    TB = _choose_tb(B, L)
    NB = -(-B // TB)
    Bp = NB * TB

    # Fold conv bias + BatchNorm (eval mode, running stats) into scale/shift,
    # and fold the scale into the conv weights.
    scale1 = p['g1'] / jnp.sqrt(p['v1'] + BN_EPS)
    shift1 = p['be1'] + (p['b1'] - p['m1']) * scale1
    scale2 = p['g2'] / jnp.sqrt(p['v2'] + BN_EPS)
    shift2 = p['be2'] + (p['b2'] - p['m2']) * scale2

    w1t = jnp.transpose(p['w1'][:, 0, :], (1, 0)) * scale1[None, :]          # (3, C1)
    w1t = jnp.pad(w1t, ((0, K_TAPS - 3), (0, 0)))                            # (K_TAPS, C1) f32
    w2s = (jnp.transpose(p['w2'], (2, 1, 0))
           * scale2[None, None, :]).astype(jnp.bfloat16)                     # (3, C1, C2)
    # fc1 weight: fold PyTorch flatten order (c*L4 + l) and the K-grouping into
    # an (NG, G*C2, HID) layout.
    wfc1_g = (p['wfc1'].reshape(HID, C2, L4).transpose(2, 1, 0)
              .reshape(NG, G * C2, HID)).astype(jnp.bfloat16)
    wfc2_p = (jnp.zeros((HID, OUT_PAD), jnp.float32)
              .at[:, :OUT].set(p['wfc2'].T).astype(jnp.bfloat16))            # (HID, 128)
    bfc2_p = jnp.zeros((1, OUT_PAD), jnp.float32).at[:, :OUT].set(p['bfc2'][None, :])

    # Host-side im2col (k=3, pad=1), batch pad, and per-block row reordering:
    # within a block, rows = [even positions | odd positions], each l-major
    # (row = l2*TB + b).  This removes all boundary masks and in-kernel shifts.
    xb = jnp.pad(x_ncl[:, 0, :].astype(jnp.float32), ((0, Bp - B), (0, 0)))  # (Bp, L)
    xm1 = jnp.pad(xb, ((0, 0), (1, 0)))[:, :L]                               # x[l-1]
    xp1 = jnp.pad(xb, ((0, 0), (0, 1)))[:, 1:]                               # x[l+1]
    x3 = jnp.stack([xm1, xb, xp1], axis=-1)                                  # (Bp, L, 3)
    x3 = jnp.pad(x3, ((0, 0), (0, 0), (0, K_TAPS - 3)))                      # (Bp, L, K_TAPS)
    x3 = (x3.reshape(NB, TB, L2, 2, K_TAPS)
            .transpose(0, 3, 2, 1, 4)                                        # (NB, 2, L2, TB, K)
            .reshape(NB * L * TB, K_TAPS))

    def res(shape):                    # weight spec: resident across the grid
        n = len(shape)
        return pl.BlockSpec(shape, lambda i, n=n: (0,) * n)

    grid_spec = pltpu.PrefetchScalarGridSpec(
        num_scalar_prefetch=0,
        grid=(NB,),
        in_specs=[
            pl.BlockSpec((L * TB, K_TAPS), lambda i: (i, 0)),                # x3 (batch-blocked)
            res((K_TAPS, C1)), res((1, C1)),                                 # w1 (scaled), shift1
            res((3, C1, C2)), res((1, C2)),                                  # w2 (scaled), shift2
            res((NG, G * C2, HID)), res((1, HID)),                           # wfc1 (grouped), bfc1
            res((HID, OUT_PAD)), res((1, OUT_PAD)),                          # wfc2, bfc2
        ],
        out_specs=pl.BlockSpec((TB, OUT_PAD), lambda i: (i, 0)),
        scratch_shapes=[
            pltpu.VMEM(((L2 + 2) * TB, C1), jnp.bfloat16),    # pooled conv1 out + conv2 halo
            pltpu.VMEM((L2 * TB, C2), jnp.bfloat16),          # conv2 out (pool2/fc1 source)
        ],
    )

    out_padded = pl.pallas_call(
        functools.partial(_cnn_kernel, TB=TB, L2=L2, G=G, NG=NG),
        out_shape=jax.ShapeDtypeStruct((Bp, OUT_PAD), jnp.float32),
        grid_spec=grid_spec,
        compiler_params=pltpu.CompilerParams(
            dimension_semantics=("parallel",),
            vmem_limit_bytes=32 * 1024 * 1024),
    )(x3, w1t, shift1[None, :], w2s, shift2[None, :],
      wfc1_g, p['bfc1'][None, :], wfc2_p, bfc2_p)

    return out_padded[:B, :OUT]


# ------------------------- params & pure-JAX reference -------------------------
def init_params(key, seq_len):
    l4 = seq_len // 4
    ks = jax.random.split(key, 20)
    u = jax.random.uniform

    def kaiming(k, shape, fan_in):
        bound = np.sqrt(2.0) * np.sqrt(3.0 / fan_in)
        return u(k, shape, jnp.float32, -bound, bound)

    p = {}
    p['w1'] = kaiming(ks[0], (C1, C_IN, 3), C_IN * 3)
    p['b1'] = u(ks[1], (C1,), jnp.float32, -1 / np.sqrt(C_IN * 3), 1 / np.sqrt(C_IN * 3))
    p['g1'] = u(ks[2], (C1,), jnp.float32, 0.5, 1.5)
    p['be1'] = u(ks[3], (C1,), jnp.float32, -0.1, 0.1)
    p['m1'] = u(ks[4], (C1,), jnp.float32, -0.1, 0.1)
    p['v1'] = u(ks[5], (C1,), jnp.float32, 0.5, 1.5)

    p['w2'] = kaiming(ks[6], (C2, C1, 3), C1 * 3)
    p['b2'] = u(ks[7], (C2,), jnp.float32, -1 / np.sqrt(C1 * 3), 1 / np.sqrt(C1 * 3))
    p['g2'] = u(ks[8], (C2,), jnp.float32, 0.5, 1.5)
    p['be2'] = u(ks[9], (C2,), jnp.float32, -0.1, 0.1)
    p['m2'] = u(ks[10], (C2,), jnp.float32, -0.1, 0.1)
    p['v2'] = u(ks[11], (C2,), jnp.float32, 0.5, 1.5)

    fin1 = C2 * l4
    p['wfc1'] = u(ks[12], (HID, fin1), jnp.float32, -1 / np.sqrt(fin1), 1 / np.sqrt(fin1))
    p['bfc1'] = u(ks[13], (HID,), jnp.float32, -1 / np.sqrt(fin1), 1 / np.sqrt(fin1))
    p['wfc2'] = u(ks[14], (OUT, HID), jnp.float32, -1 / np.sqrt(HID), 1 / np.sqrt(HID))
    p['bfc2'] = u(ks[15], (OUT,), jnp.float32, -1 / np.sqrt(HID), 1 / np.sqrt(HID))
    return p


def ref_forward(x, p):
    def conv1d(x, w, b):
        y = jax.lax.conv_general_dilated(x, w, window_strides=(1,), padding=[(1, 1)],
                                         dimension_numbers=('NCH', 'OIH', 'NCH'))
        return y + b[None, :, None]

    def bn(x, g, be, m, v):
        return (x - m[None, :, None]) * (g / jnp.sqrt(v + BN_EPS))[None, :, None] + be[None, :, None]

    def pool(x):
        B, C, L = x.shape
        return jnp.max(x.reshape(B, C, L // 2, 2), axis=-1)

    y = pool(jnp.maximum(bn(conv1d(x, p['w1'], p['b1']),
                            p['g1'], p['be1'], p['m1'], p['v1']), 0.0))
    y = pool(jnp.maximum(bn(conv1d(y, p['w2'], p['b2']),
                            p['g2'], p['be2'], p['m2'], p['v2']), 0.0))
    h = y.reshape(y.shape[0], -1)
    z = jnp.maximum(h @ p['wfc1'].T + p['bfc1'], 0.0)
    return z @ p['wfc2'].T + p['bfc2']


# ----------------------------------- main -----------------------------------
if __name__ == "__main__":
    B = 2
    SEQ = 64          # small sequence_length for the demo (divisible by 4)

    key = jax.random.PRNGKey(0)
    kx, kp = jax.random.split(key)
    x = jax.random.normal(kx, (B, C_IN, SEQ), dtype=jnp.float32)   # PyTorch NCL input
    params = init_params(kp, SEQ)

    out = jax.block_until_ready(modified_cnn_forward(x, params))
    ref = jax.block_until_ready(ref_forward(x, params))

    err = float(jnp.max(jnp.abs(out - ref)))
    scale = float(jnp.maximum(1.0, jnp.max(jnp.abs(ref))))
    assert out.shape == (B, OUT)
    assert np.isfinite(np.asarray(out)).all()
    # bf16 MXU inputs with f32 accumulation -> allow a small relative tolerance.
    assert err / scale < 5e-2, f"mismatch vs reference: {err}"

    print("KERNEL_OK")
</pallas_src>

<mosaic_0001>
module attributes {stable_mosaic.version = 11 : i64} {
  func.func @_cnn_kernel(%arg0: i32, %arg1: memref<512x8xf32, #tpu.memory_space<vmem>>, %arg2: memref<8x32xf32, #tpu.memory_space<vmem>>, %arg3: memref<1x32xf32, #tpu.memory_space<vmem>>, %arg4: memref<3x32x64xbf16, #tpu.memory_space<vmem>>, %arg5: memref<1x64xf32, #tpu.memory_space<vmem>>, %arg6: memref<4x256x256xbf16, #tpu.memory_space<vmem>>, %arg7: memref<1x256xf32, #tpu.memory_space<vmem>>, %arg8: memref<256x128xbf16, #tpu.memory_space<vmem>>, %arg9: memref<1x128xf32, #tpu.memory_space<vmem>>, %arg10: memref<8x128xf32, #tpu.memory_space<vmem>>, %arg11: memref<272x32xbf16, #tpu.memory_space<vmem>>, %arg12: memref<256x64xbf16, #tpu.memory_space<vmem>>) attributes {dimension_semantics = [#tpu.dimension_semantics<parallel>], iteration_bounds = array<i64: 1>, scalar_prefetch = 0 : i64, scratch_operands = 2 : i64, tpu.core_type = #tpu.core_type<tc>, window_params = [{transform_indices = @transform_0, window_bounds = array<i64: 512, 8>}, {pipeline_mode = #tpu.pipeline_mode<synchronous>, transform_indices = @transform_1, window_bounds = array<i64: 8, 32>}, {pipeline_mode = #tpu.pipeline_mode<synchronous>, transform_indices = @transform_2, window_bounds = array<i64: 1, 32>}, {pipeline_mode = #tpu.pipeline_mode<synchronous>, transform_indices = @transform_3, window_bounds = array<i64: 3, 32, 64>}, {pipeline_mode = #tpu.pipeline_mode<synchronous>, transform_indices = @transform_4, window_bounds = array<i64: 1, 64>}, {pipeline_mode = #tpu.pipeline_mode<synchronous>, transform_indices = @transform_5, window_bounds = array<i64: 4, 256, 256>}, {pipeline_mode = #tpu.pipeline_mode<synchronous>, transform_indices = @transform_6, window_bounds = array<i64: 1, 256>}, {pipeline_mode = #tpu.pipeline_mode<synchronous>, transform_indices = @transform_7, window_bounds = array<i64: 256, 128>}, {pipeline_mode = #tpu.pipeline_mode<synchronous>, transform_indices = @transform_8, window_bounds = array<i64: 1, 128>}, {transform_indices = @transform_9, window_bounds = array<i64: 8, 128>}]} {
    %c0 = arith.constant 0 : index
    %c0_0 = arith.constant 0 : index
    %0 = vector.load %arg2[%c0, %c0_0] : memref<8x32xf32, #tpu.memory_space<vmem>>, vector<8x32xf32>
    %c0_1 = arith.constant 0 : index
    %c0_2 = arith.constant 0 : index
    %1 = vector.load %arg3[%c0_1, %c0_2] : memref<1x32xf32, #tpu.memory_space<vmem>>, vector<1x32xf32>
    %c0_3 = arith.constant 0 : index
    %c0_4 = arith.constant 0 : index
    %2 = vector.load %arg1[%c0_3, %c0_4] : memref<512x8xf32, #tpu.memory_space<vmem>>, vector<256x8xf32>
    %cst = arith.constant dense<0.000000e+00> : vector<256x32xf32>
    %3 = tpu.matmul %2, %0, %cst {dimension_numbers = #tpu.dot_dimension_numbers<[1], [0], [0], [1], [0, 0, 1, 1], [], []>} : vector<256x8xf32>, vector<8x32xf32>, vector<256x32xf32> -> vector<256x32xf32>
    %4 = vector.broadcast %1 : vector<1x32xf32> to vector<256x32xf32>
    %5 = arith.addf %3, %4 : vector<256x32xf32>
    %cst_5 = arith.constant 0.000000e+00 : f32
    %6 = vector.broadcast %cst_5 : f32 to vector<256x32xf32>
    %7 = arith.maximumf %5, %6 : vector<256x32xf32>
    %c256 = arith.constant 256 : index
    %c0_6 = arith.constant 0 : index
    %8 = vector.load %arg1[%c256, %c0_6] : memref<512x8xf32, #tpu.memory_space<vmem>>, vector<256x8xf32>
    %cst_7 = arith.constant dense<0.000000e+00> : vector<256x32xf32>
    %9 = tpu.matmul %8, %0, %cst_7 {dimension_numbers = #tpu.dot_dimension_numbers<[1], [0], [0], [1], [0, 0, 1, 1], [], []>} : vector<256x8xf32>, vector<8x32xf32>, vector<256x32xf32> -> vector<256x32xf32>
    %10 = vector.broadcast %1 : vector<1x32xf32> to vector<256x32xf32>
    %11 = arith.addf %9, %10 : vector<256x32xf32>
    %cst_8 = arith.constant 0.000000e+00 : f32
    %12 = vector.broadcast %cst_8 : f32 to vector<256x32xf32>
    %13 = arith.maximumf %11, %12 : vector<256x32xf32>
    %cst_9 = arith.constant 0.000000e+00 : bf16
    %14 = vector.broadcast %cst_9 : bf16 to vector<8x32xbf16>
    %c0_10 = arith.constant 0 : index
    %c0_11 = arith.constant 0 : index
    %15 = vector.load %arg11[%c0_10, %c0_11] : memref<272x32xbf16, #tpu.memory_space<vmem>>, vector<8x32xbf16>
    tpu.vector_store %arg11[%c0_10, %c0_11], %14 {strides = array<i32>} : memref<272x32xbf16, #tpu.memory_space<vmem>>, vector<8x32xbf16>,
    %cst_12 = arith.constant 0.000000e+00 : bf16
    %16 = vector.broadcast %cst_12 : bf16 to vector<8x32xbf16>
    %c264 = arith.constant 264 : index
    %c0_13 = arith.constant 0 : index
    %17 = vector.load %arg11[%c264, %c0_13] : memref<272x32xbf16, #tpu.memory_space<vmem>>, vector<8x32xbf16>
    tpu.vector_store %arg11[%c264, %c0_13], %16 {strides = array<i32>} : memref<272x32xbf16, #tpu.memory_space<vmem>>, vector<8x32xbf16>,
    %18 = arith.maximumf %7, %13 : vector<256x32xf32>
    %19 = arith.truncf %18 : vector<256x32xf32> to vector<256x32xbf16>
    %c8 = arith.constant 8 : index
    %c0_14 = arith.constant 0 : index
    %20 = vector.load %arg11[%c8, %c0_14] : memref<272x32xbf16, #tpu.memory_space<vmem>>, vector<256x32xbf16>
    tpu.vector_store %arg11[%c8, %c0_14], %19 {strides = array<i32>} : memref<272x32xbf16, #tpu.memory_space<vmem>>, vector<256x32xbf16>,
    %c0_15 = arith.constant 0 : index
    %c0_16 = arith.constant 0 : index
    %21 = vector.load %arg11[%c0_15, %c0_16] : memref<272x32xbf16, #tpu.memory_space<vmem>>, vector<256x32xbf16>
    %c0_17 = arith.constant 0 : index
    %c0_18 = arith.constant 0 : index
    %c0_19 = arith.constant 0 : index
    %22 = vector.load %arg4[%c0_17, %c0_18, %c0_19] : memref<3x32x64xbf16, #tpu.memory_space<vmem>>, vector<1x32x64xbf16>
    %23 = vector.shape_cast %22 : vector<1x32x64xbf16> to vector<32x64xbf16>
    %cst_20 = arith.constant dense<0.000000e+00> : vector<256x64xf32>
    %24 = tpu.matmul %21, %23, %cst_20 {dimension_numbers = #tpu.dot_dimension_numbers<[1], [0], [0], [1], [0, 0, 1, 1], [], []>} : vector<256x32xbf16>, vector<32x64xbf16>, vector<256x64xf32> -> vector<256x64xf32>
    %c8_21 = arith.constant 8 : index
    %c0_22 = arith.constant 0 : index
    %25 = vector.load %arg11[%c8_21, %c0_22] : memref<272x32xbf16, #tpu.memory_space<vmem>>, vector<256x32xbf16>
    %c1 = arith.constant 1 : index
    %c0_23 = arith.constant 0 : index
    %c0_24 = arith.constant 0 : index
    %26 = vector.load %arg4[%c1, %c0_23, %c0_24] : memref<3x32x64xbf16, #tpu.memory_space<vmem>>, vector<1x32x64xbf16>
    %27 = vector.shape_cast %26 : vector<1x32x64xbf16> to vector<32x64xbf16>
    %cst_25 = arith.constant dense<0.000000e+00> : vector<256x64xf32>
    %28 = tpu.matmul %25, %27, %cst_25 {dimension_numbers = #tpu.dot_dimension_numbers<[1], [0], [0], [1], [0, 0, 1, 1], [], []>} : vector<256x32xbf16>, vector<32x64xbf16>, vector<256x64xf32> -> vector<256x64xf32>
    %29 = arith.addf %24, %28 : vector<256x64xf32>
    %c16 = arith.constant 16 : index
    %c0_26 = arith.constant 0 : index
    %30 = vector.load %arg11[%c16, %c0_26] : memref<272x32xbf16, #tpu.memory_space<vmem>>, vector<256x32xbf16>
    %c2 = arith.constant 2 : index
    %c0_27 = arith.constant 0 : index
    %c0_28 = arith.constant 0 : index
    %31 = vector.load %arg4[%c2, %c0_27, %c0_28] : memref<3x32x64xbf16, #tpu.memory_space<vmem>>, vector<1x32x64xbf16>
    %32 = vector.shape_cast %31 : vector<1x32x64xbf16> to vector<32x64xbf16>
    %cst_29 = arith.constant dense<0.000000e+00> : vector<256x64xf32>
    %33 = tpu.matmul %30, %32, %cst_29 {dimension_numbers = #tpu.dot_dimension_numbers<[1], [0], [0], [1], [0, 0, 1, 1], [], []>} : vector<256x32xbf16>, vector<32x64xbf16>, vector<256x64xf32> -> vector<256x64xf32>
    %34 = arith.addf %29, %33 : vector<256x64xf32>
    %c0_30 = arith.constant 0 : index
    %c0_31 = arith.constant 0 : index
    %35 = vector.load %arg5[%c0_30, %c0_31] : memref<1x64xf32, #tpu.memory_space<vmem>>, vector<1x64xf32>
    %36 = vector.broadcast %35 : vector<1x64xf32> to vector<256x64xf32>
    %37 = arith.addf %34, %36 : vector<256x64xf32>
    %cst_32 = arith.constant 0.000000e+00 : f32
    %38 = vector.broadcast %cst_32 : f32 to vector<256x64xf32>
    %39 = arith.maximumf %37, %38 : vector<256x64xf32>
    %40 = arith.truncf %39 : vector<256x64xf32> to vector<256x64xbf16>
    %c0_33 = arith.constant 0 : index
    %c0_34 = arith.constant 0 : index
    %41 = vector.load %arg12[%c0_33, %c0_34] : memref<256x64xbf16, #tpu.memory_space<vmem>>, vector<256x64xbf16>
    tpu.vector_store %arg12[%c0_33, %c0_34], %40 {strides = array<i32>} : memref<256x64xbf16, #tpu.memory_space<vmem>>, vector<256x64xbf16>,
    %cst_35 = arith.constant 0.000000e+00 : f32
    %42 = vector.broadcast %cst_35 : f32 to vector<8x256xf32>
    %c0_36 = arith.constant 0 : index
    %c0_37 = arith.constant 0 : index
    %43 = vector.load %arg12[%c0_36, %c0_37] : memref<256x64xbf16, #tpu.memory_space<vmem>>, vector<8x64xbf16>
    %c8_38 = arith.constant 8 : index
    %c0_39 = arith.constant 0 : index
    %44 = vector.load %arg12[%c8_38, %c0_39] : memref<256x64xbf16, #tpu.memory_space<vmem>>, vector<8x64xbf16>
    %45 = arith.maximumf %43, %44 : vector<8x64xbf16>
    %c16_40 = arith.constant 16 : index
    %c0_41 = arith.constant 0 : index
    %46 = vector.load %arg12[%c16_40, %c0_41] : memref<256x64xbf16, #tpu.memory_space<vmem>>, vector<8x64xbf16>
    %c24 = arith.constant 24 : index
    %c0_42 = arith.constant 0 : index
    %47 = vector.load %arg12[%c24, %c0_42] : memref<256x64xbf16, #tpu.memory_space<vmem>>, vector<8x64xbf16>
    %48 = arith.maximumf %46, %47 : vector<8x64xbf16>
    %c32 = arith.constant 32 : index
    %c0_43 = arith.constant 0 : index
    %49 = vector.load %arg12[%c32, %c0_43] : memref<256x64xbf16, #tpu.memory_space<vmem>>, vector<8x64xbf16>
    %c40 = arith.constant 40 : index
    %c0_44 = arith.constant 0 : index
    %50 = vector.load %arg12[%c40, %c0_44] : memref<256x64xbf16, #tpu.memory_space<vmem>>, vector<8x64xbf16>
    %51 = arith.maximumf %49, %50 : vector<8x64xbf16>
    %c48 = arith.constant 48 : index
    %c0_45 = arith.constant 0 : index
    %52 = vector.load %arg12[%c48, %c0_45] : memref<256x64xbf16, #tpu.memory_space<vmem>>, vector<8x64xbf16>
    %c56 = arith.constant 56 : index
    %c0_46 = arith.constant 0 : index
    %53 = vector.load %arg12[%c56, %c0_46] : memref<256x64xbf16, #tpu.memory_space<vmem>>, vector<8x64xbf16>
    %54 = arith.maximumf %52, %53 : vector<8x64xbf16>
    %55 = tpu.concatenate %45, %48, %51, %54 in 1 : vector<8x64xbf16>, vector<8x64xbf16>, vector<8x64xbf16>, vector<8x64xbf16> -> vector<8x256xbf16>
    %c0_47 = arith.constant 0 : index
    %c0_48 = arith.constant 0 : index
    %c0_49 = arith.constant 0 : index
    %56 = vector.load %arg6[%c0_47, %c0_48, %c0_49] : memref<4x256x256xbf16, #tpu.memory_space<vmem>>, vector<1x256x256xbf16>
    %57 = vector.shape_cast %56 : vector<1x256x256xbf16> to vector<256x256xbf16>
    %cst_50 = arith.constant dense<0.000000e+00> : vector<8x256xf32>
    %58 = tpu.matmul %55, %57, %cst_50 {dimension_numbers = #tpu.dot_dimension_numbers<[1], [0], [0], [1], [0, 0, 1, 1], [], []>} : vector<8x256xbf16>, vector<256x256xbf16>, vector<8x256xf32> -> vector<8x256xf32>
    %59 = arith.addf %42, %58 : vector<8x256xf32>
    %c64 = arith.constant 64 : index
    %c0_51 = arith.constant 0 : index
    %60 = vector.load %arg12[%c64, %c0_51] : memref<256x64xbf16, #tpu.memory_space<vmem>>, vector<8x64xbf16>
    %c72 = arith.constant 72 : index
    %c0_52 = arith.constant 0 : index
    %61 = vector.load %arg12[%c72, %c0_52] : memref<256x64xbf16, #tpu.memory_space<vmem>>, vector<8x64xbf16>
    %62 = arith.maximumf %60, %61 : vector<8x64xbf16>
    %c80 = arith.constant 80 : index
    %c0_53 = arith.constant 0 : index
    %63 = vector.load %arg12[%c80, %c0_53] : memref<256x64xbf16, #tpu.memory_space<vmem>>, vector<8x64xbf16>
    %c88 = arith.constant 88 : index
    %c0_54 = arith.constant 0 : index
    %64 = vector.load %arg12[%c88, %c0_54] : memref<256x64xbf16, #tpu.memory_space<vmem>>, vector<8x64xbf16>
    %65 = arith.maximumf %63, %64 : vector<8x64xbf16>
    %c96 = arith.constant 96 : index
    %c0_55 = arith.constant 0 : index
    %66 = vector.load %arg12[%c96, %c0_55] : memref<256x64xbf16, #tpu.memory_space<vmem>>, vector<8x64xbf16>
    %c104 = arith.constant 104 : index
    %c0_56 = arith.constant 0 : index
    %67 = vector.load %arg12[%c104, %c0_56] : memref<256x64xbf16, #tpu.memory_space<vmem>>, vector<8x64xbf16>
    %68 = arith.maximumf %66, %67 : vector<8x64xbf16>
    %c112 = arith.constant 112 : index
    %c0_57 = arith.constant 0 : index
    %69 = vector.load %arg12[%c112, %c0_57] : memref<256x64xbf16, #tpu.memory_space<vmem>>, vector<8x64xbf16>
    %c120 = arith.constant 120 : index
    %c0_58 = arith.constant 0 : index
    %70 = vector.load %arg12[%c120, %c0_58] : memref<256x64xbf16, #tpu.memory_space<vmem>>, vector<8x64xbf16>
    %71 = arith.maximumf %69, %70 : vector<8x64xbf16>
    %72 = tpu.concatenate %62, %65, %68, %71 in 1 : vector<8x64xbf16>, vector<8x64xbf16>, vector<8x64xbf16>, vector<8x64xbf16> -> vector<8x256xbf16>
    %c1_59 = arith.constant 1 : index
    %c0_60 = arith.constant 0 : index
    %c0_61 = arith.constant 0 : index
    %73 = vector.load %arg6[%c1_59, %c0_60, %c0_61] : memref<4x256x256xbf16, #tpu.memory_space<vmem>>, vector<1x256x256xbf16>
    %74 = vector.shape_cast %73 : vector<1x256x256xbf16> to vector<256x256xbf16>
    %cst_62 = arith.constant dense<0.000000e+00> : vector<8x256xf32>
    %75 = tpu.matmul %72, %74, %cst_62 {dimension_numbers = #tpu.dot_dimension_numbers<[1], [0], [0], [1], [0, 0, 1, 1], [], []>} : vector<8x256xbf16>, vector<256x256xbf16>, vector<8x256xf32> -> vector<8x256xf32>
    %76 = arith.addf %59, %75 : vector<8x256xf32>
    %c128 = arith.constant 128 : index
    %c0_63 = arith.constant 0 : index
    %77 = vector.load %arg12[%c128, %c0_63] : memref<256x64xbf16, #tpu.memory_space<vmem>>, vector<8x64xbf16>
    %c136 = arith.constant 136 : index
    %c0_64 = arith.constant 0 : index
    %78 = vector.load %arg12[%c136, %c0_64] : memref<256x64xbf16, #tpu.memory_space<vmem>>, vector<8x64xbf16>
    %79 = arith.maximumf %77, %78 : vector<8x64xbf16>
    %c144 = arith.constant 144 : index
    %c0_65 = arith.constant 0 : index
    %80 = vector.load %arg12[%c144, %c0_65] : memref<256x64xbf16, #tpu.memory_space<vmem>>, vector<8x64xbf16>
    %c152 = arith.constant 152 : index
    %c0_66 = arith.constant 0 : index
    %81 = vector.load %arg12[%c152, %c0_66] : memref<256x64xbf16, #tpu.memory_space<vmem>>, vector<8x64xbf16>
    %82 = arith.maximumf %80, %81 : vector<8x64xbf16>
    %c160 = arith.constant 160 : index
    %c0_67 = arith.constant 0 : index
    %83 = vector.load %arg12[%c160, %c0_67] : memref<256x64xbf16, #tpu.memory_space<vmem>>, vector<8x64xbf16>
    %c168 = arith.constant 168 : index
    %c0_68 = arith.constant 0 : index
    %84 = vector.load %arg12[%c168, %c0_68] : memref<256x64xbf16, #tpu.memory_space<vmem>>, vector<8x64xbf16>
    %85 = arith.maximumf %83, %84 : vector<8x64xbf16>
    %c176 = arith.constant 176 : index
    %c0_69 = arith.constant 0 : index
    %86 = vector.load %arg12[%c176, %c0_69] : memref<256x64xbf16, #tpu.memory_space<vmem>>, vector<8x64xbf16>
    %c184 = arith.constant 184 : index
    %c0_70 = arith.constant 0 : index
    %87 = vector.load %arg12[%c184, %c0_70] : memref<256x64xbf16, #tpu.memory_space<vmem>>, vector<8x64xbf16>
    %88 = arith.maximumf %86, %87 : vector<8x64xbf16>
    %89 = tpu.concatenate %79, %82, %85, %88 in 1 : vector<8x64xbf16>, vector<8x64xbf16>, vector<8x64xbf16>, vector<8x64xbf16> -> vector<8x256xbf16>
    %c2_71 = arith.constant 2 : index
    %c0_72 = arith.constant 0 : index
    %c0_73 = arith.constant 0 : index
    %90 = vector.load %arg6[%c2_71, %c0_72, %c0_73] : memref<4x256x256xbf16, #tpu.memory_space<vmem>>, vector<1x256x256xbf16>
    %91 = vector.shape_cast %90 : vector<1x256x256xbf16> to vector<256x256xbf16>
    %cst_74 = arith.constant dense<0.000000e+00> : vector<8x256xf32>
    %92 = tpu.matmul %89, %91, %cst_74 {dimension_numbers = #tpu.dot_dimension_numbers<[1], [0], [0], [1], [0, 0, 1, 1], [], []>} : vector<8x256xbf16>, vector<256x256xbf16>, vector<8x256xf32> -> vector<8x256xf32>
    %93 = arith.addf %76, %92 : vector<8x256xf32>
    %c192 = arith.constant 192 : index
    %c0_75 = arith.constant 0 : index
    %94 = vector.load %arg12[%c192, %c0_75] : memref<256x64xbf16, #tpu.memory_space<vmem>>, vector<8x64xbf16>
    %c200 = arith.constant 200 : index
    %c0_76 = arith.constant 0 : index
    %95 = vector.load %arg12[%c200, %c0_76] : memref<256x64xbf16, #tpu.memory_space<vmem>>, vector<8x64xbf16>
    %96 = arith.maximumf %94, %95 : vector<8x64xbf16>
    %c208 = arith.constant 208 : index
    %c0_77 = arith.constant 0 : index
    %97 = vector.load %arg12[%c208, %c0_77] : memref<256x64xbf16, #tpu.memory_space<vmem>>, vector<8x64xbf16>
    %c216 = arith.constant 216 : index
    %c0_78 = arith.constant 0 : index
    %98 = vector.load %arg12[%c216, %c0_78] : memref<256x64xbf16, #tpu.memory_space<vmem>>, vector<8x64xbf16>
    %99 = arith.maximumf %97, %98 : vector<8x64xbf16>
    %c224 = arith.constant 224 : index
    %c0_79 = arith.constant 0 : index
    %100 = vector.load %arg12[%c224, %c0_79] : memref<256x64xbf16, #tpu.memory_space<vmem>>, vector<8x64xbf16>
    %c232 = arith.constant 232 : index
    %c0_80 = arith.constant 0 : index
    %101 = vector.load %arg12[%c232, %c0_80] : memref<256x64xbf16, #tpu.memory_space<vmem>>, vector<8x64xbf16>
    %102 = arith.maximumf %100, %101 : vector<8x64xbf16>
    %c240 = arith.constant 240 : index
    %c0_81 = arith.constant 0 : index
    %103 = vector.load %arg12[%c240, %c0_81] : memref<256x64xbf16, #tpu.memory_space<vmem>>, vector<8x64xbf16>
    %c248 = arith.constant 248 : index
    %c0_82 = arith.constant 0 : index
    %104 = vector.load %arg12[%c248, %c0_82] : memref<256x64xbf16, #tpu.memory_space<vmem>>, vector<8x64xbf16>
    %105 = arith.maximumf %103, %104 : vector<8x64xbf16>
    %106 = tpu.concatenate %96, %99, %102, %105 in 1 : vector<8x64xbf16>, vector<8x64xbf16>, vector<8x64xbf16>, vector<8x64xbf16> -> vector<8x256xbf16>
    %c3 = arith.constant 3 : index
    %c0_83 = arith.constant 0 : index
    %c0_84 = arith.constant 0 : index
    %107 = vector.load %arg6[%c3, %c0_83, %c0_84] : memref<4x256x256xbf16, #tpu.memory_space<vmem>>, vector<1x256x256xbf16>
    %108 = vector.shape_cast %107 : vector<1x256x256xbf16> to vector<256x256xbf16>
    %cst_85 = arith.constant dense<0.000000e+00> : vector<8x256xf32>
    %109 = tpu.matmul %106, %108, %cst_85 {dimension_numbers = #tpu.dot_dimension_numbers<[1], [0], [0], [1], [0, 0, 1, 1], [], []>} : vector<8x256xbf16>, vector<256x256xbf16>, vector<8x256xf32> -> vector<8x256xf32>
    %110 = arith.addf %93, %109 : vector<8x256xf32>
    %c0_86 = arith.constant 0 : index
    %c0_87 = arith.constant 0 : index
    %111 = vector.load %arg7[%c0_86, %c0_87] : memref<1x256xf32, #tpu.memory_space<vmem>>, vector<1x256xf32>
    %112 = vector.broadcast %111 : vector<1x256xf32> to vector<8x256xf32>
    %113 = arith.addf %110, %112 : vector<8x256xf32>
    %cst_88 = arith.constant 0.000000e+00 : f32
    %114 = vector.broadcast %cst_88 : f32 to vector<8x256xf32>
    %115 = arith.maximumf %113, %114 : vector<8x256xf32>
    %116 = arith.truncf %115 : vector<8x256xf32> to vector<8x256xbf16>
    %c0_89 = arith.constant 0 : index
    %c0_90 = arith.constant 0 : index
    %117 = vector.load %arg8[%c0_89, %c0_90] : memref<256x128xbf16, #tpu.memory_space<vmem>>, vector<256x128xbf16>
    %cst_91 = arith.constant dense<0.000000e+00> : vector<8x128xf32>
    %118 = tpu.matmul %116, %117, %cst_91 {dimension_numbers = #tpu.dot_dimension_numbers<[1], [0], [0], [1], [0, 0, 1, 1], [], []>} : vector<8x256xbf16>, vector<256x128xbf16>, vector<8x128xf32> -> vector<8x128xf32>
    %c0_92 = arith.constant 0 : index
    %c0_93 = arith.constant 0 : index
    %119 = vector.load %arg9[%c0_92, %c0_93] : memref<1x128xf32, #tpu.memory_space<vmem>>, vector<1x128xf32>
    %120 = vector.broadcast %119 : vector<1x128xf32> to vector<8x128xf32>
    %121 = arith.addf %118, %120 : vector<8x128xf32>
    %c0_94 = arith.constant 0 : index
    %c0_95 = arith.constant 0 : index
    %122 = vector.load %arg10[%c0_94, %c0_95] : memref<8x128xf32, #tpu.memory_space<vmem>>, vector<8x128xf32>
    tpu.vector_store %arg10[%c0_94, %c0_95], %121 {strides = array<i32>} : memref<8x128xf32, #tpu.memory_space<vmem>>, vector<8x128xf32>,
    return
  }
  func.func @transform_0(%arg0: i32) -> (i32, i32) {
    %c0_i32 = arith.constant 0 : i32
    %c0_i32_0 = arith.constant 0 : i32
    return %arg0, %c0_i32 : i32, i32
  }
  func.func @transform_1(%arg0: i32) -> (i32, i32) {
    %c0_i32 = arith.constant 0 : i32
    %c0_i32_0 = arith.constant 0 : i32
    %c0_i32_1 = arith.constant 0 : i32
    return %c0_i32, %c0_i32_0 : i32, i32
  }
  func.func @transform_2(%arg0: i32) -> (i32, i32) {
    %c0_i32 = arith.constant 0 : i32
    %c0_i32_0 = arith.constant 0 : i32
    %c0_i32_1 = arith.constant 0 : i32
    return %c0_i32, %c0_i32_0 : i32, i32
  }
  func.func @transform_3(%arg0: i32) -> (i32, i32, i32) {
    %c0_i32 = arith.constant 0 : i32
    %c0_i32_0 = arith.constant 0 : i32
    %c0_i32_1 = arith.constant 0 : i32
    %c0_i32_2 = arith.constant 0 : i32
    return %c0_i32, %c0_i32_0, %c0_i32_1 : i32, i32, i32
  }
  func.func @transform_4(%arg0: i32) -> (i32, i32) {
    %c0_i32 = arith.constant 0 : i32
    %c0_i32_0 = arith.constant 0 : i32
    %c0_i32_1 = arith.constant 0 : i32
    return %c0_i32, %c0_i32_0 : i32, i32
  }
  func.func @transform_5(%arg0: i32) -> (i32, i32, i32) {
    %c0_i32 = arith.constant 0 : i32
    %c0_i32_0 = arith.constant 0 : i32
    %c0_i32_1 = arith.constant 0 : i32
    %c0_i32_2 = arith.constant 0 : i32
    return %c0_i32, %c0_i32_0, %c0_i32_1 : i32, i32, i32
  }
  func.func @transform_6(%arg0: i32) -> (i32, i32) {
    %c0_i32 = arith.constant 0 : i32
    %c0_i32_0 = arith.constant 0 : i32
    %c0_i32_1 = arith.constant 0 : i32
    return %c0_i32, %c0_i32_0 : i32, i32
  }
  func.func @transform_7(%arg0: i32) -> (i32, i32) {
    %c0_i32 = arith.constant 0 : i32
    %c0_i32_0 = arith.constant 0 : i32
    %c0_i32_1 = arith.constant 0 : i32
    return %c0_i32, %c0_i32_0 : i32, i32
  }
  func.func @transform_8(%arg0: i32) -> (i32, i32) {
    %c0_i32 = arith.constant 0 : i32
    %c0_i32_0 = arith.constant 0 : i32
    %c0_i32_1 = arith.constant 0 : i32
    return %c0_i32, %c0_i32_0 : i32, i32
  }
  func.func @transform_9(%arg0: i32) -> (i32, i32) {
    %c0_i32 = arith.constant 0 : i32
    %c0_i32_0 = arith.constant 0 : i32
    return %arg0, %c0_i32 : i32, i32
  }
}

</mosaic_0001>

<bundles_post_ra>
// kernel: tpu_custom_call.1
= control target key start
LH: loop header
LB: loop body
LE: loop exit
PB: predicated region body
PF: predicated region fallthrough
CT: control target
= control target key end

     0   :  { %14 = vsyncpa [#allocation5], 0  ;;  %s4799_s0 = inlined_call_operand.vmem [shape: f32[512,8], index: 0, kind: input, shape index: {}]   ;;  %s4800_s1 = inlined_call_operand.vmem [shape: f32[8,32], index: 1, kind: input, shape index: {}]   ;;  %s4801_s2 = inlined_call_operand.vmem [shape: f32[1,32], index: 2, kind: input, shape index: {}]   ;;  %s4802_s3 = inlined_call_operand.vmem [shape: bf16[3,32,64], index: 3, kind: input, shape index: {}]   ;;  %s4803_s4 = inlined_call_operand.vmem [shape: f32[1,64], index: 4, kind: input, shape index: {}]   ;;  %s4804_s5 = inlined_call_operand.hbm [shape: bf16[4,256,256], index: 5, kind: input, shape index: {}]   ;;  %s4805_s6 = inlined_call_operand.vmem [shape: f32[1,256], index: 6, kind: input, shape index: {}]   ;;  %s4806_s7 = inlined_call_operand.vmem [shape: bf16[256,128], index: 7, kind: input, shape index: {}]   ;;  %s4807_s8 = inlined_call_operand.vmem [shape: f32[1,128], index: 8, kind: input, shape index: {}]   ;;  %s4808_s9 = inlined_call_operand.hbm [shape: f32[8,128], index: 9, kind: output, shape index: {}]  }
   0x1   :  { %15 = vsyncpa [#allocation6], 0  ;;  %s4056_s30 = smov [#allocation4]   ;;  %s4008_s13 = scalar_lea.hbm %s4804_s5, 16384 }
   0x2   :  { %s31_s10 = sshll.u32 %s4056_s30, 4  ;;  %p4009_p0 = scmp.ne.s32.totalorder %s4804_s5, %s4008_s13  ;;  %s32_s10 = int_to_ptr.vmem [resolvable:$true] %s31_s10 }
   0x3   :  { %p4012_p1 = scmp.lt.u32.totalorder %s4008_s13, %s4804_s5 }
   0x5   :  { %p4014_p2 = pnand %p4012_p1, %p4009_p0 }
   0x7   :  { %4017 = shalt.err (!%p4014_p2)
}
   0x8   :  { %s4018_s18 = scalar_lea.vmem %s32_s10, 16384  ;;  %p4023_p4 = scmp.lt.s32.totalorder %s32_s10, %s32_s10 }
   0x9   :  { %p4019_p3 = scmp.ne.s32.totalorder %s32_s10, %s4018_s18  ;;  %p4024_p5 = scmp.lt.s32.totalorder %s4018_s18, %s4018_s18 }
   0xb   :  { %p4025_p6 = por %p4024_p5, %p4023_p4 }
   0xd   :  { %p4026_p7 = pnand %p4025_p6, %p4019_p3 }
   0xf   :  { %4029 = shalt.err (!%p4026_p7)
}
  0x10   :  { %s4057_s19 = smov 128   ;;  %s4058_s20 = smov 8  }
  0x11   :  { %37 = dma.hbm_to_vmem [thread:$0]  %s4804_s5, 16384, %s32_s10, [#allocation5], %s4057_s19, %s4057_s19, %s4058_s20  }
  0x12   :  { %4052 = dma.done.wait [#allocation5], 16384  }
  0x13   :  { %4053 = vsyncadd [#allocation5], 4294950912  ;;  %vm88_vm0 = vcmask 64512   ;;  %v48_v0 = vld [vmem:[%s4800_s1] sm:$0xff]  ;;  %v75_v2 = vld [vmem:[%s4799_s0 + $0xc8] sm:$0xff]  ;;  %vm829_vm1 = vcmask 261124  }
  0x14   :  { %v74_v1 = vld [vmem:[%s4799_s0 + $0xc0] sm:$0xff]  ;;  %3722 = vmatprep.subr.mxu1 %v48_v0  ;;  %v76_v3 = vld [vmem:[%s4799_s0 + $0xd0] sm:$0xff]  ;;  %3514 = vmatprep.subr.mxu0 %v48_v0  ;;  %v51_v5 = vld [vmem:[%s4799_s0 + $0x8] sm:$0xff]  ;;  %vm827_vm2 = vcmask 257024   ;;  %vm895_vm3 = vcmask 1043456   ;;  %vm945_vm4 = vcmask 261120  }
  0x15   :  { %3552 = vmatprep.mubr.msk.f32.mxu1 %vm88_vm0, %v74_v1  ;;  %3723 = vmatpush3.msra.mxu1 %v48_v0  ;;  %v50_v4 = vld [vmem:[%s4799_s0] sm:$0xff]  ;;  %v77_v6 = vld [vmem:[%s4799_s0 + $0xd8] sm:$0xff]  ;;  %v52_v7 = vld [vmem:[%s4799_s0 + $0x10] sm:$0xff]  ;;  %vm1782_vm5 = vcmask 523264   ;;  %s4061_s12 = smov [#allocation7]  }
  0x16   :  { %3553 = vmatmul.mubr.msk.f32.vlgmr.msra.gmra.mrb[0].mxu1 %vm88_vm0, %v75_v2  ;;  %3564 = vmatprep.subr.mxu1 %v48_v0  ;;  %v78_v8 = vld [vmem:[%s4799_s0 + $0xe0] sm:$0xff]  ;;  %v53_v9 = vld [vmem:[%s4799_s0 + $0x18] sm:$0xff]  ;;  %v79_v10 = vld [vmem:[%s4799_s0 + $0xe8] sm:$0xff]  ;;  %v4059_v2 = vmov 0   ;;  %s3090_s13 = sshll.u32 %s4061_s12, 4  ;;  %s3091_s13 = int_to_ptr.vmem [resolvable:$true] %s3090_s13 }
  0x17   :  { %3565 = vmatpush3.msra.mxu1 %v48_v0  ;;  %3555 = vmatprep.mubr.msk.f32.mxu1 %vm88_vm0, %v76_v3  ;;  %v54_v11 = vld [vmem:[%s4799_s0 + $0x20] sm:$0xff]  ;;  %v80_v12 = vld [vmem:[%s4799_s0 + $0xf0] sm:$0xff]  ;;  %v55_v13 = vld [vmem:[%s4799_s0 + $0x28] sm:$0xff]  ;;  %830 = vst.msk [vmem:[#allocation2 + $0x80] sm:$0xf0] %vm829_vm1, %v4059_v2  ;;  %s4030_s14 = scalar_lea.vmem %s3091_s13, 128  ;;  %p4035_p9 = scmp.lt.s32.totalorder %s3091_s13, %s3091_s13 }
  0x18   :  { %3515 = vmatpush3.msra.mxu0 %v48_v0  ;;  %3516 = vmatprep.mubr.msk.f32.mxu0 %vm88_vm0, %v50_v4  ;;  %v81_v14 = vld [vmem:[%s4799_s0 + $0xf8] sm:$0xff]  ;;  %v56_v15 = vld [vmem:[%s4799_s0 + $0x30] sm:$0xff]  ;;  %v442_v16 = vld [vmem:[%s4799_s0 + $0x100] sm:$0xff]  ;;  %828 = vst.msk [vmem:[#allocation2] sm:$0xf] %vm827_vm2, %v4059_v2  ;;  %p4031_p8 = scmp.ne.s32.totalorder %s3091_s13, %s4030_s14  ;;  %p4036_p10 = scmp.lt.s32.totalorder %s4030_s14, %s4030_s14 }
  0x19   :  { %3517 = vmatmul.mubr.msk.f32.vlgmr.msra.gmra.mrb[0].mxu0 %vm88_vm0, %v51_v5  ;;  %v57_v17 = vld [vmem:[%s4799_s0 + $0x38] sm:$0xff]  ;;  %v443_v18 = vld [vmem:[%s4799_s0 + $0x108] sm:$0xff]  ;;  %v58_v19 = vld [vmem:[%s4799_s0 + $0x40] sm:$0xff] }
  0x1a   :  { %3556 = vmatmul.mubr.msk.f32.gmra.mrb[2].mxu1 %vm88_vm0, %v77_v6  ;;  %3519 = vmatprep.mubr.msk.f32.mxu0 %vm88_vm0, %v52_v7  ;;  %v444_v20 = vld [vmem:[%s4799_s0 + $0x110] sm:$0xff]  ;;  %v59_v21 = vld [vmem:[%s4799_s0 + $0x48] sm:$0xff]  ;;  %v445_v22 = vld [vmem:[%s4799_s0 + $0x118] sm:$0xff]  ;;  %p4037_p11 = por %p4036_p10, %p4035_p9 }
  0x1b   :  { %3558 = vmatprep.mubr.msk.f32.mxu1 %vm88_vm0, %v78_v8  ;;  %v60_v23 = vld [vmem:[%s4799_s0 + $0x50] sm:$0xff]  ;;  %v446_v24 = vld [vmem:[%s4799_s0 + $0x120] sm:$0xff]  ;;  %v61_v25 = vld [vmem:[%s4799_s0 + $0x58] sm:$0xff] }
  0x1c   :  { %v447_v26 = vld [vmem:[%s4799_s0 + $0x128] sm:$0xff]  ;;  %v62_v27 = vld [vmem:[%s4799_s0 + $0x60] sm:$0xff]  ;;  %v448_v28 = vld [vmem:[%s4799_s0 + $0x130] sm:$0xff]  ;;  %p4038_p12 = pnand %p4037_p11, %p4031_p8 }
  0x1d   :  { %3520 = vmatmul.mubr.msk.f32.gmra.mrb[2].mxu0 %vm88_vm0, %v53_v9  ;;  %v63_v29 = vld [vmem:[%s4799_s0 + $0x68] sm:$0xff]  ;;  %v449_v30 = vld [vmem:[%s4799_s0 + $0x138] sm:$0xff]  ;;  %v64_v31 = vld [vmem:[%s4799_s0 + $0x70] sm:$0xff] }
  0x1e   :  { %3559 = vmatmul.mubr.msk.f32.gmra.mrb[4].mxu1 %vm88_vm0, %v79_v10  ;;  %3522 = vmatprep.mubr.msk.f32.mxu0 %vm88_vm0, %v54_v11  ;;  %v450_v32 = vld [vmem:[%s4799_s0 + $0x140] sm:$0xff]  ;;  %v65_v33 = vld [vmem:[%s4799_s0 + $0x78] sm:$0xff]  ;;  %v451_v34 = vld [vmem:[%s4799_s0 + $0x148] sm:$0xff] }
  0x1f   :  { %3561 = vmatprep.mubr.msk.f32.mxu1 %vm88_vm0, %v80_v12  ;;  %v66_v35 = vld [vmem:[%s4799_s0 + $0x80] sm:$0xff]  ;;  %v452_v36 = vld [vmem:[%s4799_s0 + $0x150] sm:$0xff]  ;;  %v67_v37 = vld [vmem:[%s4799_s0 + $0x88] sm:$0xff] }
  0x20   :  { %v453_v38 = vld [vmem:[%s4799_s0 + $0x158] sm:$0xff]  ;;  %v68_v39 = vld [vmem:[%s4799_s0 + $0x90] sm:$0xff]  ;;  %v454_v40 = vld [vmem:[%s4799_s0 + $0x160] sm:$0xff] }
  0x21   :  { %3523 = vmatmul.mubr.msk.f32.gmra.mrb[4].mxu0 %vm88_vm0, %v55_v13  ;;  %v69_v41 = vld [vmem:[%s4799_s0 + $0x98] sm:$0xff]  ;;  %v455_v42 = vld [vmem:[%s4799_s0 + $0x168] sm:$0xff]  ;;  %v70_v43 = vld [vmem:[%s4799_s0 + $0xa0] sm:$0xff] }
  0x22   :  { %3562 = vmatmul.mubr.msk.f32.gmra.mrb[6].mxu1 %vm88_vm0, %v81_v14  ;;  %3525 = vmatprep.mubr.msk.f32.mxu0 %vm88_vm0, %v56_v15  ;;  %v456_v44 = vld [vmem:[%s4799_s0 + $0x170] sm:$0xff]  ;;  %v71_v45 = vld [vmem:[%s4799_s0 + $0xa8] sm:$0xff]  ;;  %v457_v46 = vld [vmem:[%s4799_s0 + $0x178] sm:$0xff] }
  0x23   :  { %3566 = vmatprep.mubr.msk.f32.mxu1 %vm88_vm0, %v442_v16  ;;  %v72_v47 = vld [vmem:[%s4799_s0 + $0xb0] sm:$0xff]  ;;  %v458_v48 = vld [vmem:[%s4799_s0 + $0x180] sm:$0xff]  ;;  %v73_v49 = vld [vmem:[%s4799_s0 + $0xb8] sm:$0xff] }
  0x24   :  { %v459_v50 = vld [vmem:[%s4799_s0 + $0x188] sm:$0xff]  ;;  %v460_v51 = vld [vmem:[%s4799_s0 + $0x190] sm:$0xff]  ;;  %v461_v52 = vld [vmem:[%s4799_s0 + $0x198] sm:$0xff] }
  0x25   :  { %3526 = vmatmul.mubr.msk.f32.gmra.mrb[6].mxu0 %vm88_vm0, %v57_v17  ;;  %v462_v53 = vld [vmem:[%s4799_s0 + $0x1a0] sm:$0xff]  ;;  %v463_v54 = vld [vmem:[%s4799_s0 + $0x1a8] sm:$0xff]  ;;  %v464_v55 = vld [vmem:[%s4799_s0 + $0x1b0] sm:$0xff] }
  0x26   :  { %3567 = vmatmul.mubr.msk.f32.vlgmr.msra.gmra.mrb[8].mxu1 %vm88_vm0, %v443_v18  ;;  %3528 = vmatprep.mubr.msk.f32.mxu0 %vm88_vm0, %v58_v19  ;;  %v465_v56 = vld [vmem:[%s4799_s0 + $0x1b8] sm:$0xff]  ;;  %v466_v57 = vld [vmem:[%s4799_s0 + $0x1c0] sm:$0xff]  ;;  %v467_v58 = vld [vmem:[%s4799_s0 + $0x1c8] sm:$0xff] }
  0x27   :  { %3569 = vmatprep.mubr.msk.f32.mxu1 %vm88_vm0, %v444_v20  ;;  %v468_v59 = vld [vmem:[%s4799_s0 + $0x1d0] sm:$0xff]  ;;  %v469_v60 = vld [vmem:[%s4799_s0 + $0x1d8] sm:$0xff]  ;;  %v470_v61 = vld [vmem:[%s4799_s0 + $0x1e0] sm:$0xff] }
  0x28   :  { %v471_v62 = vld [vmem:[%s4799_s0 + $0x1e8] sm:$0xff]  ;;  %v472_v63 = vld [vmem:[%s4799_s0 + $0x1f0] sm:$0xff]  ;;  %v473_v0 = vld [vmem:[%s4799_s0 + $0x1f8] sm:$0xff] }
  0x29   :  { %3529 = vmatmul.mubr.msk.f32.gmra.mrb[8].mxu0 %vm88_vm0, %v59_v21  ;;  %v3794_v1 = vld [vmem:[%s4802_s3 + $0x10] sm:$0xff]   ;;  %v3795_v3 = vld [vmem:[%s4802_s3 + $0x18] sm:$0xff]   ;;  %v4394_v4 = vld [vmem:[%s4802_s3] sm:$0xff]  }
  0x2a   :  { %3570 = vmatmul.mubr.msk.f32.gmra.mrb[10].mxu1 %vm88_vm0, %v445_v22  ;;  %3531 = vmatprep.mubr.msk.f32.mxu0 %vm88_vm0, %v60_v23  ;;  %v4412_v16 = vld [vmem:[%s4801_s2] ss:$0 sm:$0xff] }
  0x2b   :  { %3572 = vmatprep.mubr.msk.f32.mxu1 %vm88_vm0, %v446_v24  ;;  %3614 = vmatprep.subr.bf16.mxu0 %v3794_v1 }
  0x2c   :  { %3615 = vmatpush3.bf16.msra.mxu0 %v3794_v1 }
  0x2d   :  { %3532 = vmatmul.mubr.msk.f32.gmra.mrb[10].mxu0 %vm88_vm0, %v61_v25  ;;  %3616 = vmatprep.subr.bf16.mxu0 %v3795_v3 }
  0x2e   :  { %3573 = vmatmul.mubr.msk.f32.gmra.mrb[12].mxu1 %vm88_vm0, %v447_v26  ;;  %3534 = vmatprep.mubr.msk.f32.mxu0 %vm88_vm0, %v62_v27 }
  0x2f   :  { %3575 = vmatprep.mubr.msk.f32.mxu1 %vm88_vm0, %v448_v28 }
  0x30   :  { %3617 = vmatpush3.bf16.msra.mxu0 %v3795_v3 }
  0x31   :  { %3535 = vmatmul.mubr.msk.f32.gmra.mrb[12].mxu0 %vm88_vm0, %v63_v29  ;;  %3650 = vmatprep.subr.bf16.mxu0 %v4394_v4 }
  0x32   :  { %3576 = vmatmul.mubr.msk.f32.gmra.mrb[14].mxu1 %vm88_vm0, %v449_v30  ;;  %3537 = vmatprep.mubr.msk.f32.mxu0 %vm88_vm0, %v64_v31 }
  0x33   :  { %3578 = vmatprep.mubr.msk.f32.mxu1 %vm88_vm0, %v450_v32 }
  0x35   :  { %3538 = vmatmul.mubr.msk.f32.gmra.mrb[14].mxu0 %vm88_vm0, %v65_v33 }
  0x36   :  { %3579 = vmatmul.mubr.msk.f32.gmra.mrb[16].mxu1 %vm88_vm0, %v451_v34  ;;  %3540 = vmatprep.mubr.msk.f32.mxu0 %vm88_vm0, %v66_v35 }
  0x37   :  { %3581 = vmatprep.mubr.msk.f32.mxu1 %vm88_vm0, %v452_v36 }
  0x39   :  { %3541 = vmatmul.mubr.msk.f32.gmra.mrb[16].mxu0 %vm88_vm0, %v67_v37 }
  0x3a   :  { %3582 = vmatmul.mubr.msk.f32.gmra.mrb[18].mxu1 %vm88_vm0, %v453_v38  ;;  %3543 = vmatprep.mubr.msk.f32.mxu0 %vm88_vm0, %v68_v39 }
  0x3b   :  { %3584 = vmatprep.mubr.msk.f32.mxu1 %vm88_vm0, %v454_v40 }
  0x3d   :  { %3544 = vmatmul.mubr.msk.f32.gmra.mrb[18].mxu0 %vm88_vm0, %v69_v41 }
  0x3e   :  { %3585 = vmatmul.mubr.msk.f32.gmra.mrb[20].mxu1 %vm88_vm0, %v455_v42  ;;  %3546 = vmatprep.mubr.msk.f32.mxu0 %vm88_vm0, %v70_v43 }
  0x3f   :  { %3587 = vmatprep.mubr.msk.f32.mxu1 %vm88_vm0, %v456_v44 }
  0x41   :  { %3547 = vmatmul.mubr.msk.f32.gmra.mrb[20].mxu0 %vm88_vm0, %v71_v45 }
  0x42   :  { %3588 = vmatmul.mubr.msk.f32.gmra.mrb[22].mxu1 %vm88_vm0, %v457_v46  ;;  %3549 = vmatprep.mubr.msk.f32.mxu0 %vm88_vm0, %v72_v47 }
  0x43   :  { %3590 = vmatprep.mubr.msk.f32.mxu1 %vm88_vm0, %v458_v48 }
  0x45   :  { %3550 = vmatmul.mubr.msk.f32.gmra.mrb[22].mxu0 %vm88_vm0, %v73_v49 }
  0x46   :  { %3591 = vmatmul.mubr.msk.f32.gmra.mrb[24].mxu1 %vm88_vm0, %v459_v50 }
  0x47   :  { %3593 = vmatprep.mubr.msk.f32.mxu1 %vm88_vm0, %v460_v51 }
  0x4a   :  { %3594 = vmatmul.mubr.msk.f32.gmra.mrb[26].mxu1 %vm88_vm0, %v461_v52 }
  0x4b   :  { %3596 = vmatprep.mubr.msk.f32.mxu1 %vm88_vm0, %v462_v53 }
  0x4e   :  { %3597 = vmatmul.mubr.msk.f32.gmra.mrb[28].mxu1 %vm88_vm0, %v463_v54 }
  0x4f   :  { %3599 = vmatprep.mubr.msk.f32.mxu1 %vm88_vm0, %v464_v55 }
  0x52   :  { %3600 = vmatmul.mubr.msk.f32.gmra.mrb[30].mxu1 %vm88_vm0, %v465_v56 }
  0x53   :  { %3602 = vmatprep.mubr.msk.f32.mxu1 %vm88_vm0, %v466_v57 }
  0x56   :  { %3603 = vmatmul.mubr.msk.f32.gmra.mrb[32].mxu1 %vm88_vm0, %v467_v58 }
  0x57   :  { %3605 = vmatprep.mubr.msk.f32.mxu1 %vm88_vm0, %v468_v59 }
  0x5a   :  { %3606 = vmatmul.mubr.msk.f32.gmra.mrb[34].mxu1 %vm88_vm0, %v469_v60 }
  0x5b   :  { %3608 = vmatprep.mubr.msk.f32.mxu1 %vm88_vm0, %v470_v61 }
  0x5e   :  { %3609 = vmatmul.mubr.msk.f32.gmra.mrb[36].mxu1 %vm88_vm0, %v471_v62 }
  0x5f   :  { %3611 = vmatprep.mubr.msk.f32.mxu1 %vm88_vm0, %v472_v63 }
  0x62   :  { %3612 = vmatmul.mubr.msk.f32.gmra.mrb[38].mxu1 %vm88_vm0, %v473_v0 }
  0xe9   :  { %v4397_v5 = vpop.f32.mrb[0].mxu1 }
  0xea   :  { %v4399_v6 = vpop.f32.mrb[1].mxu1 }
  0xec   :  { %v3518_v7 = vpop.f32.mrb[0].mxu0 }
  0xed   :  { %v4401_v8 = vpop.f32.mrb[2].mxu1  ;;  %v251_v9 = vpop.f32.mrb[1].mxu0  ;;  %v257_v20 = vadd.f32 %v3518_v7, %v4412_v16 }
  0xee   :  { %v4403_v10 = vpop.f32.mrb[3].mxu1  ;;  %v252_v21 = vadd.f32 %v4412_v16, %v251_v9 }
  0xef   :  { %v411_v25 = vmax.f32 %v257_v20, 0.0 }
  0xf0   :  { %v3521_v11 = vpop.f32.mrb[2].mxu0  ;;  %v410_v29 = vmax.f32 %v252_v21, 0.0 }
  0xf1   :  { %v4405_v12 = vpop.f32.mrb[4].mxu1  ;;  %v261_v13 = vpop.f32.mrb[3].mxu0  ;;  %v267_v28 = vadd.f32 %v3521_v11, %v4412_v16 }
  0xf2   :  { %v4407_v14 = vpop.f32.mrb[5].mxu1  ;;  %v262_v31 = vadd.f32 %v4412_v16, %v261_v13 }
  0xf3   :  { %v413_v39 = vmax.f32 %v267_v28, 0.0 }
  0xf4   :  { %v3524_v15 = vpop.f32.mrb[4].mxu0  ;;  %v412_v44 = vmax.f32 %v262_v31, 0.0 }
  0xf5   :  { %v4414_v17 = vpop.f32.mrb[6].mxu1  ;;  %v271_v18 = vpop.f32.mrb[5].mxu0  ;;  %v277_v36 = vadd.f32 %v3524_v15, %v4412_v16 }
  0xf6   :  { %v4416_v19 = vpop.f32.mrb[7].mxu1  ;;  %v272_v42 = vadd.f32 %v4412_v16, %v271_v18 }
  0xf7   :  { %v415_v50 = vmax.f32 %v277_v36, 0.0 }
  0xf8   :  { %v3527_v22 = vpop.f32.mrb[6].mxu0  ;;  %v414_v55 = vmax.f32 %v272_v42, 0.0 }
  0xf9   :  { %v3568_v23 = vpop.f32.mrb[8].mxu1  ;;  %v281_v24 = vpop.f32.mrb[7].mxu0  ;;  %v287_v57 = vadd.f32 %v3527_v22, %v4412_v16 }
  0xfa   :  { %v642_v26 = vadd.f32 %v3568_v23, %v4412_v16  ;;  %v636_v27 = vpop.f32.mrb[9].mxu1  ;;  %v282_v61 = vadd.f32 %v4412_v16, %v281_v24 }
  0xfb   :  { %v637_v30 = vadd.f32 %v4412_v16, %v636_v27  ;;  %v417_v11 = vmax.f32 %v287_v57, 0.0 }
  0xfc   :  { %v796_v32 = vmax.f32 %v642_v26, 0.0  ;;  %v3530_v33 = vpop.f32.mrb[8].mxu0  ;;  %v416_v22 = vmax.f32 %v282_v61, 0.0 }
  0xfd   :  { %v795_v34 = vmax.f32 %v637_v30, 0.0  ;;  %v3571_v35 = vpop.f32.mrb[10].mxu1  ;;  %v291_v37 = vpop.f32.mrb[9].mxu0  ;;  %v297_v3 = vadd.f32 %v3530_v33, %v4412_v16 }
  0xfe   :  { %v832_v38 = vmax.f32 %v411_v25, %v796_v32  ;;  %v652_v40 = vadd.f32 %v3571_v35, %v4412_v16  ;;  %v646_v41 = vpop.f32.mrb[11].mxu1  ;;  %v292_v18 = vadd.f32 %v4412_v16, %v291_v37 }
  0xff   :  { %v831_v43 = vmax.f32 %v410_v29, %v795_v34  ;;  %v647_v45 = vadd.f32 %v4412_v16, %v646_v41  ;;  %v419_v29 = vmax.f32 %v297_v3, 0.0 }
 0x100   :  { %v798_v46 = vmax.f32 %v652_v40, 0.0  ;;  %v3533_v47 = vpop.f32.mrb[10].mxu0  ;;  %v418_v34 = vmax.f32 %v292_v18, 0.0 }
 0x101   :  { %v863_v48 = vpack.c.bf16 %v832_v38, %v831_v43  ;;  %v797_v49 = vmax.f32 %v647_v45, 0.0  ;;  %v3574_v51 = vpop.f32.mrb[12].mxu1  ;;  %v301_v52 = vpop.f32.mrb[11].mxu0  ;;  %v307_v36 = vadd.f32 %v3533_v47, %v4412_v16 }
 0x102   :  { %v834_v53 = vmax.f32 %v413_v39, %v798_v46  ;;  %v662_v54 = vadd.f32 %v3574_v51, %v4412_v16  ;;  %v656_v56 = vpop.f32.mrb[13].mxu1  ;;  %v302_v40 = vadd.f32 %v4412_v16, %v301_v52 }
 0x103   :  { %v896_v58 = vrot.slane %v863_v48, 4  ;;  %v833_v59 = vmax.f32 %v412_v44, %v797_v49  ;;  %v657_v60 = vadd.f32 %v4412_v16, %v656_v56  ;;  %v421_v51 = vmax.f32 %v307_v36, 0.0 }
 0x104   :  { %v800_v62 = vmax.f32 %v662_v54, 0.0  ;;  %v3536_v63 = vpop.f32.mrb[12].mxu0  ;;  %v420_v56 = vmax.f32 %v302_v40, 0.0 }
 0x105   :  { %944 = vst.msk [vmem:[#allocation2] sm:$0xf0] %vm829_vm1, %v896_v58  ;;  %v864_v0 = vpack.c.bf16 %v834_v53, %v833_v59  ;;  %v799_v1 = vmax.f32 %v657_v60, 0.0  ;;  %v3577_v2 = vpop.f32.mrb[14].mxu1  ;;  %v311_v7 = vpop.f32.mrb[13].mxu0  ;;  %v317_v42 = vadd.f32 %v3536_v63, %v4412_v16 }
 0x106   :  { %v836_v9 = vmax.f32 %v415_v50, %v800_v62  ;;  %v672_v13 = vadd.f32 %v3577_v2, %v4412_v16  ;;  %v666_v15 = vpop.f32.mrb[15].mxu1  ;;  %v312_v43 = vadd.f32 %v4412_v16, %v311_v7 }
 0x107   :  { %v897_v20 = vrot.slane %v864_v0, 4  ;;  %v835_v21 = vmax.f32 %v414_v55, %v799_v1  ;;  %v667_v23 = vadd.f32 %v4412_v16, %v666_v15  ;;  %v423_v60 = vmax.f32 %v317_v42, 0.0 }
 0x108   :  { %v802_v24 = vmax.f32 %v672_v13, 0.0  ;;  %v3539_v25 = vpop.f32.mrb[14].mxu0  ;;  %v422_v61 = vmax.f32 %v312_v43, 0.0 }
 0x109   :  { %v898_v26 = vsel %vm895_vm3, %v896_v58, %v897_v20  ;;  %v865_v27 = vpack.c.bf16 %v836_v9, %v835_v21  ;;  %v801_v28 = vmax.f32 %v667_v23, 0.0  ;;  %v3580_v30 = vpop.f32.mrb[16].mxu1  ;;  %v321_v31 = vpop.f32.mrb[15].mxu0  ;;  %v327_v3 = vadd.f32 %v3539_v25, %v4412_v16 }
 0x10a   :  { %946 = vst.msk [vmem:[#allocation2 + $0x8] sm:$0xff] %vm945_vm4, %v898_v26  ;;  %v838_v32 = vmax.f32 %v417_v11, %v802_v24  ;;  %v682_v33 = vadd.f32 %v3580_v30, %v4412_v16  ;;  %v676_v35 = vpop.f32.mrb[17].mxu1  ;;  %v322_v24 = vadd.f32 %v4412_v16, %v321_v31 }
 0x10b   :  { %v899_v37 = vrot.slane %v865_v27, 4  ;;  %v837_v38 = vmax.f32 %v416_v22, %v801_v28  ;;  %v677_v39 = vadd.f32 %v4412_v16, %v676_v35 }
 0x10c   :  { %v804_v41 = vmax.f32 %v682_v33, 0.0  ;;  %v3542_v44 = vpop.f32.mrb[16].mxu0  ;;  %v982_v58 = vld [vmem:[#allocation2] sm:$0xf0]  ;;  %v424_v43 = vmax.f32 %v322_v24, 0.0 }
 0x10d   :  { %v900_v45 = vsel %vm895_vm3, %v897_v20, %v899_v37  ;;  %v866_v46 = vpack.c.bf16 %v838_v32, %v837_v38  ;;  %v803_v48 = vmax.f32 %v677_v39, 0.0  ;;  %v3583_v49 = vpop.f32.mrb[18].mxu1  ;;  %v331_v50 = vpop.f32.mrb[17].mxu0  ;;  %v1006_v18 = vrot.slane %v982_v58, 4 }
 0x10e   :  { %947 = vst.msk [vmem:[#allocation2 + $0x10] sm:$0xff] %vm945_vm4, %v900_v45  ;;  %v840_v47 = vmax.f32 %v419_v29, %v804_v41  ;;  %v692_v53 = vadd.f32 %v3583_v49, %v4412_v16  ;;  %v686_v54 = vpop.f32.mrb[19].mxu1  ;;  %v337_v27 = vadd.f32 %v3542_v44, %v4412_v16  ;;  %v332_v35 = vadd.f32 %v4412_v16, %v331_v50  ;;  %v3797_v45 = vld [vmem:[%s4802_s3 + $0x8] sm:$0xff]  }
 0x10f   :  { %v901_v52 = vrot.slane %v866_v46, 4  ;;  %v839_v55 = vmax.f32 %v418_v34, %v803_v48  ;;  %v687_v57 = vadd.f32 %v4412_v16, %v686_v54 }
 0x110   :  { %v806_v59 = vmax.f32 %v692_v53, 0.0  ;;  %v3545_v62 = vpop.f32.mrb[18].mxu0  ;;  %v427_v48 = vmax.f32 %v337_v27, 0.0 }
 0x111   :  { %v902_v63 = vsel %vm895_vm3, %v899_v37, %v901_v52  ;;  %v867_v0 = vpack.c.bf16 %v840_v47, %v839_v55  ;;  %v805_v1 = vmax.f32 %v687_v57, 0.0  ;;  %v3586_v2 = vpop.f32.mrb[20].mxu1  ;;  %v4451_v7 = vld [vmem:[#allocation2 + $0x8] sm:$0xff]  ;;  %v341_v9 = vpop.f32.mrb[19].mxu0  ;;  %v425_v37 = vmax.f32 %v327_v3, 0.0  ;;  %v4487_v3 = vld [vmem:[%s4802_s3 + $0x20] sm:$0xff]  }
 0x112   :  { %948 = vst.msk [vmem:[#allocation2 + $0x18] sm:$0xff] %vm945_vm4, %v902_v63  ;;  %v842_v11 = vmax.f32 %v421_v51, %v806_v59  ;;  %v702_v13 = vadd.f32 %v3586_v2, %v4412_v16  ;;  %v696_v15 = vpop.f32.mrb[21].mxu1  ;;  %v1007_v20 = vrot.slane %v4451_v7, 4  ;;  %v342_v2 = vadd.f32 %v4412_v16, %v341_v9 }
 0x113   :  { %v903_v21 = vrot.slane %v867_v0, 4  ;;  %v841_v22 = vmax.f32 %v420_v56, %v805_v1  ;;  %v697_v23 = vadd.f32 %v4412_v16, %v696_v15 }
 0x114   :  { %v808_v26 = vmax.f32 %v702_v13, 0.0  ;;  %v1008_v25 = vsel %vm895_vm3, %v1006_v18, %v1007_v20  ;;  %v3548_v28 = vpop.f32.mrb[20].mxu0 }
 0x115   :  { %v904_v29 = vsel %vm895_vm3, %v901_v52, %v903_v21  ;;  %v868_v30 = vpack.c.bf16 %v842_v11, %v841_v22  ;;  %v807_v32 = vmax.f32 %v697_v23, 0.0  ;;  %v3589_v33 = vpop.f32.mrb[22].mxu1  ;;  %3618 = vmatprep.mubr.msk.bf16.mxu0 %vm945_vm4, %v1008_v25  ;;  %v4462_v34 = vld [vmem:[#allocation2 + $0x10] sm:$0xff]  ;;  %v351_v36 = vpop.f32.mrb[21].mxu0  ;;  %v426_v52 = vmax.f32 %v332_v35, 0.0 }
 0x116   :  { %949 = vst.msk [vmem:[#allocation2 + $0x20] sm:$0xff] %vm945_vm4, %v904_v29  ;;  %v844_v31 = vmax.f32 %v423_v60, %v808_v26  ;;  %v712_v38 = vadd.f32 %v3589_v33, %v4412_v16  ;;  %v706_v39 = vpop.f32.mrb[23].mxu1  ;;  %v1009_v40 = vrot.slane %v4462_v34, 4  ;;  %v347_v60 = vadd.f32 %v3545_v62, %v4412_v16 }
 0x117   :  { %v905_v41 = vrot.slane %v868_v30, 4  ;;  %v843_v42 = vmax.f32 %v422_v61, %v807_v32  ;;  %v707_v44 = vadd.f32 %v4412_v16, %v706_v39  ;;  %v352_v9 = vadd.f32 %v4412_v16, %v351_v36 }
 0x118   :  { %v810_v46 = vmax.f32 %v712_v38, 0.0  ;;  %v1010_v49 = vsel %vm895_vm3, %v1007_v20, %v1009_v40  ;;  %v3551_v50 = vpop.f32.mrb[22].mxu0  ;;  %v429_v23 = vmax.f32 %v347_v60, 0.0  ;;  %v428_v29 = vmax.f32 %v342_v2, 0.0 }
 0x119   :  { %v906_v47 = vsel %vm895_vm3, %v903_v21, %v905_v41  ;;  %v869_v51 = vpack.c.bf16 %v844_v31, %v843_v42  ;;  %v809_v53 = vmax.f32 %v707_v44, 0.0  ;;  %v3592_v54 = vpop.f32.mrb[24].mxu1  ;;  %3619 = vmatmul.mubr.msk.bf16.vlgmr.msra.gmra.mrb[24].mxu0 %vm945_vm4, %v1010_v49  ;;  %v4475_v55 = vld [vmem:[#allocation2 + $0x18] sm:$0xff]  ;;  %v361_v56 = vpop.f32.mrb[23].mxu0  ;;  %v430_v39 = vmax.f32 %v352_v9, 0.0 }
 0x11a   :  { %950 = vst.msk [vmem:[#allocation2 + $0x28] sm:$0xff] %vm945_vm4, %v906_v47  ;;  %v846_v57 = vmax.f32 %v425_v37, %v810_v46  ;;  %v722_v58 = vadd.f32 %v3592_v54, %v4412_v16  ;;  %v716_v59 = vpop.f32.mrb[25].mxu1  ;;  %3651 = vmatpush3.bf16.msra.mxu0 %v4394_v4  ;;  %v1011_v61 = vrot.slane %v4475_v55, 4  ;;  %v357_v4 = vadd.f32 %v3548_v28, %v4412_v16 }
 0x11b   :  { %v907_v63 = vrot.slane %v869_v51, 4  ;;  %v845_v0 = vmax.f32 %v424_v43, %v809_v53  ;;  %v717_v1 = vadd.f32 %v4412_v16, %v716_v59  ;;  %3652 = vmatprep.subr.bf16.mxu0 %v3797_v45  ;;  %v367_v44 = vadd.f32 %v3551_v50, %v4412_v16 }
 0x11c   :  { %v812_v11 = vmax.f32 %v722_v58, 0.0  ;;  %v1012_v13 = vsel %vm895_vm3, %v1009_v40, %v1011_v61  ;;  %v431_v33 = vmax.f32 %v357_v4, 0.0  ;;  %v362_v47 = vadd.f32 %v4412_v16, %v361_v56 }
 0x11d   :  { %v908_v62 = vsel %vm895_vm3, %v905_v41, %v907_v63  ;;  %v870_v15 = vpack.c.bf16 %v846_v57, %v845_v0  ;;  %v811_v18 = vmax.f32 %v717_v1, 0.0  ;;  %v3595_v20 = vpop.f32.mrb[26].mxu1  ;;  %3622 = vmatprep.mubr.msk.bf16.mxu0 %vm945_vm4, %v1012_v13  ;;  %v4493_v21 = vld [vmem:[#allocation2 + $0x20] sm:$0xff]  ;;  %v377_v54 = vadd.f32 %v4397_v5, %v4412_v16 }
 0x11e   :  { %951 = vst.msk [vmem:[#allocation2 + $0x30] sm:$0xff] %vm945_vm4, %v908_v62  ;;  %v848_v22 = vmax.f32 %v427_v48, %v812_v11  ;;  %v732_v24 = vadd.f32 %v3595_v20, %v4412_v16  ;;  %v726_v26 = vpop.f32.mrb[27].mxu1  ;;  %v1013_v25 = vrot.slane %v4493_v21, 4  ;;  %3653 = vmatpush3.bf16.msra.mxu0 %v3797_v45  ;;  %v432_v2 = vmax.f32 %v362_v47, 0.0 }
 0x11f   :  { %v909_v27 = vrot.slane %v870_v15, 4  ;;  %v847_v28 = vmax.f32 %v426_v52, %v811_v18  ;;  %v727_v30 = vadd.f32 %v4412_v16, %v726_v26  ;;  %3686 = vmatprep.subr.bf16.mxu0 %v4487_v3  ;;  %v372_v13 = vadd.f32 %v4412_v16, %v4399_v6 }
 0x120   :  { %v814_v32 = vmax.f32 %v732_v24, 0.0  ;;  %v1014_v35 = vsel %vm895_vm3, %v1011_v61, %v1013_v25  ;;  %v433_v61 = vmax.f32 %v367_v44, 0.0  ;;  %v392_v47 = vadd.f32 %v4412_v16, %v4407_v14 }
 0x121   :  { %v910_v36 = vsel %vm895_vm3, %v907_v63, %v909_v27  ;;  %v871_v31 = vpack.c.bf16 %v848_v22, %v847_v28  ;;  %v813_v37 = vmax.f32 %v727_v30, 0.0  ;;  %v3598_v38 = vpop.f32.mrb[28].mxu1  ;;  %3623 = vmatmul.mubr.msk.bf16.gmra.mrb[28].mxu0 %vm945_vm4, %v1014_v35  ;;  %v4504_v40 = vld [vmem:[#allocation2 + $0x28] sm:$0xff]  ;;  %v434_v30 = vmax.f32 %v372_v13, 0.0 }
 0x122   :  { %952 = vst.msk [vmem:[#allocation2 + $0x38] sm:$0xff] %vm945_vm4, %v910_v36  ;;  %v850_v41 = vmax.f32 %v429_v23, %v814_v32  ;;  %v742_v42 = vadd.f32 %v3598_v38, %v4412_v16  ;;  %v736_v43 = vpop.f32.mrb[29].mxu1  ;;  %v1015_v45 = vrot.slane %v4504_v40, 4  ;;  %v387_v32 = vadd.f32 %v4401_v8, %v4412_v16 }
 0x123   :  { %v911_v46 = vrot.slane %v871_v31, 4  ;;  %v849_v48 = vmax.f32 %v428_v29, %v813_v37  ;;  %v737_v49 = vadd.f32 %v4412_v16, %v736_v43  ;;  %v382_v36 = vadd.f32 %v4412_v16, %v4403_v10 }
 0x124   :  { %v816_v51 = vmax.f32 %v742_v42, 0.0  ;;  %v1016_v53 = vsel %vm895_vm3, %v1013_v25, %v1015_v45  ;;  %v435_v25 = vmax.f32 %v377_v54, 0.0  ;;  %v397_v10 = vadd.f32 %v4405_v12, %v4412_v16 }
 0x125   :  { %v912_v52 = vsel %vm895_vm3, %v909_v27, %v911_v46  ;;  %v872_v57 = vpack.c.bf16 %v850_v41, %v849_v48  ;;  %v815_v58 = vmax.f32 %v737_v49, 0.0  ;;  %v3601_v59 = vpop.f32.mrb[30].mxu1  ;;  %3626 = vmatprep.mubr.msk.bf16.mxu0 %vm945_vm4, %v1016_v53  ;;  %v4517_v50 = vld [vmem:[#allocation2 + $0x30] sm:$0xff]  ;;  %v437_v49 = vmax.f32 %v387_v32, 0.0 }
 0x126   :  { %953 = vst.msk [vmem:[#allocation2 + $0x40] sm:$0xff] %vm945_vm4, %v912_v52  ;;  %v852_v60 = vmax.f32 %v431_v33, %v816_v51  ;;  %v752_v56 = vadd.f32 %v3601_v59, %v4412_v16  ;;  %v746_v63 = vpop.f32.mrb[31].mxu1  ;;  %v1017_v0 = vrot.slane %v4517_v50, 4  ;;  %v436_v54 = vmax.f32 %v382_v36, 0.0 }
 0x127   :  { %v913_v1 = vrot.slane %v872_v57, 4  ;;  %v851_v5 = vmax.f32 %v430_v39, %v815_v58  ;;  %v747_v11 = vadd.f32 %v4412_v16, %v746_v63  ;;  %v439_v63 = vmax.f32 %v397_v10, 0.0 }
 0x128   :  { %v818_v4 = vmax.f32 %v752_v56, 0.0  ;;  %v1018_v62 = vsel %vm895_vm3, %v1015_v45, %v1017_v0 }
 0x129   :  { %v914_v15 = vsel %vm895_vm3, %v911_v46, %v913_v1  ;;  %v873_v18 = vpack.c.bf16 %v852_v60, %v851_v5  ;;  %v817_v20 = vmax.f32 %v747_v11, 0.0  ;;  %v3604_v9 = vpop.f32.mrb[32].mxu1  ;;  %3627 = vmatmul.mubr.msk.bf16.gmra.mrb[32].mxu0 %vm945_vm4, %v1018_v62  ;;  %v4528_v22 = vld [vmem:[#allocation2 + $0x38] sm:$0xff]  ;;  %v407_v11 = vadd.f32 %v4414_v17, %v4412_v16 }
 0x12a   :  { %954 = vst.msk [vmem:[#allocation2 + $0x48] sm:$0xff] %vm945_vm4, %v914_v15  ;;  %v854_v23 = vmax.f32 %v433_v61, %v818_v4  ;;  %v762_v24 = vadd.f32 %v3604_v9, %v4412_v16  ;;  %v756_v26 = vpop.f32.mrb[33].mxu1  ;;  %v1019_v6 = vrot.slane %v4528_v22, 4  ;;  %v402_v62 = vadd.f32 %v4412_v16, %v4416_v19 }
 0x12b   :  { %v915_v27 = vrot.slane %v873_v18, 4  ;;  %v853_v28 = vmax.f32 %v432_v2, %v817_v20  ;;  %v757_v29 = vadd.f32 %v4412_v16, %v756_v26  ;;  %v438_v2 = vmax.f32 %v392_v47, 0.0 }
 0x12c   :  { %v820_v33 = vmax.f32 %v762_v24, 0.0  ;;  %v1020_v35 = vsel %vm895_vm3, %v1017_v0, %v1019_v6  ;;  %v440_v32 = vmax.f32 %v402_v62, 0.0  ;;  %v3812_v62 = vld [vmem:[#allocation4 + $0x140] ss:$8 sps:$4 sm:$0xff]  }
 0x12d   :  { %v916_v31 = vsel %vm895_vm3, %v913_v1, %v915_v27  ;;  %v874_v37 = vpack.c.bf16 %v854_v23, %v853_v28  ;;  %v819_v38 = vmax.f32 %v757_v29, 0.0  ;;  %v3607_v39 = vpop.f32.mrb[34].mxu1  ;;  %3630 = vmatprep.mubr.msk.bf16.mxu0 %vm945_vm4, %v1020_v35  ;;  %v4541_v41 = vld [vmem:[#allocation2 + $0x40] sm:$0xff]  ;;  %v441_v28 = vmax.f32 %v407_v11, 0.0  ;;  %v3814_v11 = vld [vmem:[#allocation4 + $0x144] ss:$8 sps:$4 sm:$0xff]  }
 0x12e   :  { %955 = vst.msk [vmem:[#allocation2 + $0x50] sm:$0xff] %vm945_vm4, %v916_v31  ;;  %v856_v42 = vmax.f32 %v435_v25, %v820_v33  ;;  %v772_v8 = vadd.f32 %v3607_v39, %v4412_v16  ;;  %v766_v43 = vpop.f32.mrb[35].mxu1  ;;  %v1021_v44 = vrot.slane %v4541_v41, 4 }
 0x12f   :  { %v917_v45 = vrot.slane %v874_v37, 4  ;;  %v855_v46 = vmax.f32 %v434_v30, %v819_v38  ;;  %v767_v48 = vadd.f32 %v4412_v16, %v766_v43 }
 0x130   :  { %v822_v51 = vmax.f32 %v772_v8, 0.0  ;;  %v1022_v53 = vsel %vm895_vm3, %v1019_v6, %v1021_v44 }
 0x131   :  { %v918_v52 = vsel %vm895_vm3, %v915_v27, %v917_v45  ;;  %v875_v57 = vpack.c.bf16 %v856_v42, %v855_v46  ;;  %v821_v58 = vmax.f32 %v767_v48, 0.0  ;;  %v3610_v59 = vpop.f32.mrb[36].mxu1  ;;  %3631 = vmatmul.mubr.msk.bf16.gmra.mrb[36].mxu0 %vm945_vm4, %v1022_v53  ;;  %v4554_v12 = vld [vmem:[#allocation2 + $0x48] sm:$0xff] }
 0x132   :  { %956 = vst.msk [vmem:[#allocation2 + $0x58] sm:$0xff] %vm945_vm4, %v918_v52  ;;  %v858_v60 = vmax.f32 %v437_v49, %v822_v51  ;;  %v782_v61 = vadd.f32 %v3610_v59, %v4412_v16  ;;  %v776_v56 = vpop.f32.mrb[37].mxu1  ;;  %v1023_v14 = vrot.slane %v4554_v12, 4 }
 0x133   :  { %v919_v0 = vrot.slane %v875_v57, 4  ;;  %v857_v1 = vmax.f32 %v436_v54, %v821_v58  ;;  %v777_v5 = vadd.f32 %v4412_v16, %v776_v56 }
 0x134   :  { %v824_v13 = vmax.f32 %v782_v61, 0.0  ;;  %v1024_v4 = vsel %vm895_vm3, %v1021_v44, %v1023_v14 }
 0x135   :  { %v920_v15 = vsel %vm895_vm3, %v917_v45, %v919_v0  ;;  %v876_v18 = vpack.c.bf16 %v858_v60, %v857_v1  ;;  %v823_v20 = vmax.f32 %v777_v5, 0.0  ;;  %v3613_v9 = vpop.f32.mrb[38].mxu1  ;;  %3634 = vmatprep.mubr.msk.bf16.mxu0 %vm945_vm4, %v1024_v4  ;;  %v4567_v23 = vld [vmem:[#allocation2 + $0x50] sm:$0xff]  ;;  %v3830_v1 = vld [vmem:[#allocation4 + $0x310] ss:$8 sps:$4 sm:$0xff]  }
 0x136   :  { %957 = vst.msk [vmem:[#allocation2 + $0x60] sm:$0xff] %vm945_vm4, %v920_v15  ;;  %v860_v24 = vmax.f32 %v439_v63, %v824_v13  ;;  %v792_v17 = vadd.f32 %v3613_v9, %v4412_v16  ;;  %v786_v26 = vpop.f32.mrb[39].mxu1  ;;  %v1025_v6 = vrot.slane %v4567_v23, 4  ;;  %v3799_v63 = vld [vmem:[%s4802_s3 + $0x28] sm:$0xff]   ;;  %v3838_v5 = vld [vmem:[#allocation4 + $0x324] ss:$8 sps:$4 sm:$0xff]  }
 0x137   :  { %v921_v25 = vrot.slane %v876_v18, 4  ;;  %v859_v27 = vmax.f32 %v438_v2, %v823_v20  ;;  %v787_v19 = vadd.f32 %v4412_v16, %v786_v26  ;;  %v3809_v2 = vld [vmem:[#allocation4 + $0x130] ss:$8 sps:$4 sm:$0xff]   ;;  %v3836_v13 = vld [vmem:[#allocation4 + $0x320] ss:$8 sps:$4 sm:$0xff]  }
 0x138   :  { %v826_v29 = vmax.f32 %v792_v17, 0.0  ;;  %v1026_v30 = vsel %vm895_vm3, %v1023_v14, %v1025_v6  ;;  %v962_v14 = vld [vmem:[#allocation2] sm:$0xff]  ;;  %v3820_v9 = vld [vmem:[#allocation4 + $0x164] ss:$8 sps:$4 sm:$0xff]  }
 0x139   :  { %v922_v33 = vsel %vm895_vm3, %v919_v0, %v921_v25  ;;  %v877_v35 = vpack.c.bf16 %v860_v24, %v859_v27  ;;  %v825_v36 = vmax.f32 %v787_v19, 0.0  ;;  %3635 = vmatmul.mubr.msk.bf16.gmra.mrb[40].mxu0 %vm945_vm4, %v1026_v30  ;;  %v4576_v31 = vld [vmem:[#allocation2 + $0x58] sm:$0xff]  ;;  %v3829_v26 = vld [vmem:[#allocation4 + $0x184] ss:$8 sps:$4 sm:$0xff]  }
 0x13a   :  { %958 = vst.msk [vmem:[#allocation2 + $0x68] sm:$0xff] %vm945_vm4, %v922_v33  ;;  %v862_v37 = vmax.f32 %v441_v28, %v826_v29  ;;  %v1027_v38 = vrot.slane %v4576_v31, 4  ;;  %v3811_v0 = vld [vmem:[#allocation4 + $0x134] ss:$8 sps:$4 sm:$0xff]   ;;  %v3842_v18 = vld [vmem:[#allocation4 + $0x330] ss:$8 sps:$4 sm:$0xff]  }
 0x13b   :  { %v923_v39 = vrot.slane %v877_v35, 4  ;;  %v861_v16 = vmax.f32 %v440_v32, %v825_v36  ;;  %v3844_v4 = vld [vmem:[#allocation4 + $0x334] ss:$8 sps:$4 sm:$0xff]   ;;  %v3815_v20 = vld [vmem:[#allocation4 + $0x150] ss:$8 sps:$4 sm:$0xff]  }
 0x13c   :  { %v1028_v42 = vsel %vm895_vm3, %v1025_v6, %v1027_v38  ;;  %v3817_v15 = vld [vmem:[#allocation4 + $0x154] ss:$8 sps:$4 sm:$0xff]   ;;  %v3821_v17 = vld [vmem:[#allocation4 + $0x170] ss:$8 sps:$4 sm:$0xff]   ;;  %v3827_v6 = vld [vmem:[#allocation4 + $0x180] ss:$8 sps:$4 sm:$0xff]  }
 0x13d   :  { %v924_v8 = vsel %vm895_vm3, %v921_v25, %v923_v39  ;;  %v878_v43 = vpack.c.bf16 %v862_v37, %v861_v16  ;;  %3638 = vmatprep.mubr.msk.bf16.mxu0 %vm945_vm4, %v1028_v42  ;;  %v974_v44 = vld [vmem:[#allocation2 + $0x60] sm:$0xff]  ;;  %v3841_v19 = vld [vmem:[#allocation4 + $0x1a4] ss:$8 sps:$4 sm:$0xff]   ;;  %v3839_v28 = vld [vmem:[#allocation4 + $0x1a0] ss:$8 sps:$4 sm:$0xff]  }
 0x13e   :  { %959 = vst.msk [vmem:[#allocation2 + $0x70] sm:$0xff] %vm945_vm4, %v924_v8  ;;  %v1029_v10 = vrot.slane %v974_v44, 4  ;;  %v3823_v24 = vld [vmem:[#allocation4 + $0x174] ss:$8 sps:$4 sm:$0xff]   ;;  %v3833_v27 = vld [vmem:[#allocation4 + $0x190] ss:$8 sps:$4 sm:$0xff]  }
 0x13f   :  { %v925_v45 = vrot.slane %v878_v43, 4  ;;  %v3835_v25 = vld [vmem:[#allocation4 + $0x194] ss:$8 sps:$4 sm:$0xff]   ;;  %v4658_v29 = vld [vmem:[%s4803_s4] ss:$0 sm:$0xff]  ;;  %s4060_s4 = smov 64  }
 0x140   :  { %v1030_v46 = vsel %vm895_vm3, %v1027_v38, %v1029_v10 }
 0x141   :  { %v926_v48 = vsel %vm895_vm3, %v923_v39, %v925_v45  ;;  %961 = vst.msk [vmem:[#allocation2 + $0x80] sm:$0xf] %vm827_vm2, %v925_v45  ;;  %3639 = vmatmul.mubr.msk.bf16.gmra.mrb[44].mxu0 %vm945_vm4, %v1030_v46  ;;  %v975_v49 = vld [vmem:[#allocation2 + $0x68] sm:$0xff] }
 0x142   :  { %960 = vst.msk [vmem:[#allocation2 + $0x78] sm:$0xff] %vm945_vm4, %v926_v48  ;;  %v1031_v47 = vrot.slane %v975_v49, 4 }
 0x144   :  { %v1032_v51 = vsel %vm895_vm3, %v1029_v10, %v1031_v47 }
 0x145   :  { %3642 = vmatprep.mubr.msk.bf16.mxu0 %vm945_vm4, %v1032_v51  ;;  %v976_v53 = vld [vmem:[#allocation2 + $0x70] sm:$0xff] }
 0x146   :  { %v1033_v54 = vrot.slane %v976_v53, 4 }
 0x148   :  { %v1034_v52 = vsel %vm895_vm3, %v1031_v47, %v1033_v54  ;;  %v983_v58 = vld [vmem:[#allocation2 + $0x80] sm:$0xf] }
 0x149   :  { %3643 = vmatmul.mubr.msk.bf16.gmra.mrb[48].mxu0 %vm945_vm4, %v1034_v52  ;;  %v977_v57 = vld [vmem:[#allocation2 + $0x78] sm:$0xff]  ;;  %v1037_v61 = vrot.slane %v983_v58, 4 }
 0x14a   :  { %v1035_v59 = vrot.slane %v977_v57, 4 }
 0x14c   :  { %v1036_v60 = vsel %vm895_vm3, %v1033_v54, %v1035_v59  ;;  %v1038_v56 = vsel %vm895_vm3, %v1035_v59, %v1037_v61  ;;  %v3847_v59 = vld [vmem:[#allocation4 + $0x1b4] ss:$8 sps:$4 sm:$0xff]   ;;  %v3845_v61 = vld [vmem:[#allocation4 + $0x1b0] ss:$8 sps:$4 sm:$0xff]  }
 0x14d   :  { %3646 = vmatprep.mubr.msk.bf16.mxu0 %vm945_vm4, %v1036_v60 }
 0x151   :  { %3647 = vmatmul.mubr.msk.bf16.gmra.mrb[52].mxu0 %vm945_vm4, %v1038_v56  ;;  %v3848_v56 = vld [vmem:[#allocation4 + $0x340] ss:$8 sps:$4 sm:$0xff]  }
 0x152   :  { %3654 = vmatprep.mubr.msk.bf16.mxu0 %vm945_vm4, %v962_v14  ;;  %v3850_v14 = vld [vmem:[#allocation4 + $0x344] ss:$8 sps:$4 sm:$0xff]  }
 0x159   :  { %3655 = vmatmul.mubr.msk.bf16.vlgmr.msra.gmra.mrb[24].mxu0 %vm945_vm4, %v4451_v7 }
 0x15a   :  { %3658 = vmatprep.mubr.msk.bf16.mxu0 %vm945_vm4, %v4462_v34  ;;  %3687 = vmatpush3.bf16.msra.mxu0 %v4487_v3  ;;  %v3805_v3 = vld [vmem:[#allocation4 + $0x114] ss:$8 sps:$4 sm:$0xff]  }
 0x15b   :  { %3688 = vmatprep.subr.bf16.mxu0 %v3799_v63 }
 0x15e   :  { %3689 = vmatpush3.bf16.msra.mxu0 %v3799_v63 }
 0x161   :  { %3659 = vmatmul.mubr.msk.bf16.gmra.mrb[28].mxu0 %vm945_vm4, %v4475_v55 }
 0x162   :  { %3662 = vmatprep.mubr.msk.bf16.mxu0 %vm945_vm4, %v4493_v21 }
 0x169   :  { %3663 = vmatmul.mubr.msk.bf16.gmra.mrb[32].mxu0 %vm945_vm4, %v4504_v40 }
 0x16a   :  { %3666 = vmatprep.mubr.msk.bf16.mxu0 %vm945_vm4, %v4517_v50 }
 0x171   :  { %3667 = vmatmul.mubr.msk.bf16.gmra.mrb[36].mxu0 %vm945_vm4, %v4528_v22 }
 0x172   :  { %3670 = vmatprep.mubr.msk.bf16.mxu0 %vm945_vm4, %v4541_v41 }
 0x179   :  { %3671 = vmatmul.mubr.msk.bf16.gmra.mrb[40].mxu0 %vm945_vm4, %v4554_v12 }
 0x17a   :  { %3674 = vmatprep.mubr.msk.bf16.mxu0 %vm945_vm4, %v4567_v23 }
 0x181   :  { %3675 = vmatmul.mubr.msk.bf16.gmra.mrb[44].mxu0 %vm945_vm4, %v4576_v31 }
 0x182   :  { %3678 = vmatprep.mubr.msk.bf16.mxu0 %vm945_vm4, %v974_v44 }
 0x189   :  { %3679 = vmatmul.mubr.msk.bf16.gmra.mrb[48].mxu0 %vm945_vm4, %v975_v49 }
 0x18a   :  { %3682 = vmatprep.mubr.msk.bf16.mxu0 %vm945_vm4, %v976_v53 }
 0x191   :  { %3683 = vmatmul.mubr.msk.bf16.gmra.mrb[52].mxu0 %vm945_vm4, %v977_v57 }
 0x192   :  { %3690 = vmatprep.mubr.msk.bf16.mxu0 %vm945_vm4, %v4451_v7  ;;  %v1481_v7 = vld [vmem:[#allocation2 + $0x80] sm:$0xff] }
 0x199   :  { %3691 = vmatmul.mubr.msk.bf16.vlgmr.msra.gmra.mrb[24].mxu0 %vm945_vm4, %v4462_v34  ;;  %v3800_v34 = vld [vmem:[#allocation4 + $0x100] ss:$8 sps:$4 sm:$0xff]  }
 0x19a   :  { %3694 = vmatprep.mubr.msk.bf16.mxu0 %vm945_vm4, %v4475_v55  ;;  %v3802_v55 = vld [vmem:[#allocation4 + $0x104] ss:$8 sps:$4 sm:$0xff]  }
 0x19b   :  { %2100 = vmatprep.subr.bf16.mxu1 %v3802_v55 }
 0x19c   :  { %2101 = vmatpush1.bf16.msra.mxu1 %v3800_v34 }
 0x19d   :  { %2102 = vmatprep.subr.bf16.mxu1 %v3805_v3 }
 0x1a1   :  { %3695 = vmatmul.mubr.msk.bf16.gmra.mrb[28].mxu0 %vm945_vm4, %v4493_v21  ;;  %v3803_v21 = vld [vmem:[#allocation4 + $0x110] ss:$8 sps:$4 sm:$0xff]  }
 0x1a2   :  { %3698 = vmatprep.mubr.msk.bf16.mxu0 %vm945_vm4, %v4504_v40  ;;  %v3808_v40 = vld [vmem:[#allocation4 + $0x124] ss:$8 sps:$4 sm:$0xff]   ;;  %2103 = vmatpush1.bf16.msra.mxu1 %v3803_v21 }
 0x1a3   :  { %2104 = vmatprep.subr.bf16.mxu1 %v3808_v40  ;;  %v3853_v40 = vld [vmem:[#allocation4 + $0x1c4] ss:$8 sps:$4 sm:$0xff]  }
 0x1a9   :  { %3699 = vmatmul.mubr.msk.bf16.gmra.mrb[32].mxu0 %vm945_vm4, %v4517_v50  ;;  %v3824_v50 = vld [vmem:[#allocation4 + $0x300] ss:$8 sps:$4 sm:$0xff]  }
 0x1aa   :  { %3702 = vmatprep.mubr.msk.bf16.mxu0 %vm945_vm4, %v4528_v22  ;;  %v3826_v22 = vld [vmem:[#allocation4 + $0x304] ss:$8 sps:$4 sm:$0xff]  }
 0x1ab   :  { %2847 = vmatprep.subr.bf16.mxu0 %v3826_v22 }
 0x1ac   :  { %2848 = vmatpush1.bf16.msra.mxu0 %v3824_v50 }
 0x1b1   :  { %3703 = vmatmul.mubr.msk.bf16.gmra.mrb[36].mxu0 %vm945_vm4, %v4541_v41  ;;  %v3806_v41 = vld [vmem:[#allocation4 + $0x120] ss:$8 sps:$4 sm:$0xff]  }
 0x1b2   :  { %3706 = vmatprep.mubr.msk.bf16.mxu0 %vm945_vm4, %v4554_v12  ;;  %v3832_v12 = vld [vmem:[#allocation4 + $0x314] ss:$8 sps:$4 sm:$0xff]   ;;  %2105 = vmatpush1.bf16.msra.mxu1 %v3806_v41  ;;  %v3851_v41 = vld [vmem:[#allocation4 + $0x1c0] ss:$8 sps:$4 sm:$0xff]  }
 0x1b3   :  { %2849 = vmatprep.subr.bf16.mxu0 %v3832_v12  ;;  %2106 = vmatprep.subr.bf16.mxu1 %v3811_v0  ;;  %v3854_v0 = vld [vmem:[#allocation4 + $0x350] ss:$8 sps:$4 sm:$0xff]  }
 0x1b4   :  { %2850 = vmatpush1.bf16.msra.mxu0 %v3830_v1  ;;  %v3856_v1 = vld [vmem:[#allocation4 + $0x354] ss:$8 sps:$4 sm:$0xff]  }
 0x1b5   :  { %2851 = vmatprep.subr.bf16.mxu0 %v3838_v5 }
 0x1b6   :  { %2107 = vmatpush1.bf16.msra.mxu1 %v3809_v2 }
 0x1b7   :  { %2108 = vmatprep.subr.bf16.mxu1 %v3814_v11  ;;  %v3857_v11 = vld [vmem:[#allocation4 + $0x1d0] ss:$8 sps:$4 sm:$0xff]  }
 0x1b8   :  { %2852 = vmatpush1.bf16.msra.mxu0 %v3836_v13  ;;  %v3859_v13 = vld [vmem:[#allocation4 + $0x1d4] ss:$8 sps:$4 sm:$0xff]  }
 0x1b9   :  { %3707 = vmatmul.mubr.msk.bf16.gmra.mrb[40].mxu0 %vm945_vm4, %v4567_v23  ;;  %2853 = vmatprep.subr.bf16.mxu0 %v3844_v4  ;;  %v3818_v23 = vld [vmem:[#allocation4 + $0x160] ss:$8 sps:$4 sm:$0xff]  }
 0x1ba   :  { %3710 = vmatprep.mubr.msk.bf16.mxu0 %vm945_vm4, %v4576_v31  ;;  %2109 = vmatpush1.bf16.msra.mxu1 %v3812_v62 }
 0x1bb   :  { %2110 = vmatprep.subr.bf16.mxu1 %v3817_v15  ;;  %v3862_v15 = vld [vmem:[#allocation4 + $0x364] ss:$8 sps:$4 sm:$0xff]  }
 0x1bc   :  { %2854 = vmatpush1.bf16.msra.mxu0 %v3842_v18 }
 0x1bd   :  { %2855 = vmatprep.subr.bf16.mxu0 %v3850_v14 }
 0x1be   :  { %2111 = vmatpush1.bf16.msra.mxu1 %v3815_v20  ;;  %v3860_v20 = vld [vmem:[#allocation4 + $0x360] ss:$8 sps:$4 sm:$0xff]  }
 0x1bf   :  { %2112 = vmatprep.subr.bf16.mxu1 %v3820_v9  ;;  %v3865_v9 = vld [vmem:[#allocation4 + $0x1e4] ss:$8 sps:$4 sm:$0xff]  }
 0x1c0   :  { %2856 = vmatpush1.bf16.msra.mxu0 %v3848_v56 }
 0x1c1   :  { %3711 = vmatmul.mubr.msk.bf16.gmra.mrb[44].mxu0 %vm945_vm4, %v974_v44  ;;  %2857 = vmatprep.subr.bf16.mxu0 %v3856_v1 }
 0x1c2   :  { %3714 = vmatprep.mubr.msk.bf16.mxu0 %vm945_vm4, %v975_v49  ;;  %2113 = vmatpush1.bf16.msra.mxu1 %v3818_v23 }
 0x1c3   :  { %2114 = vmatprep.subr.bf16.mxu1 %v3823_v24 }
 0x1c4   :  { %2858 = vmatpush1.bf16.msra.mxu0 %v3854_v0 }
 0x1c5   :  { %2859 = vmatprep.subr.bf16.mxu0 %v3862_v15 }
 0x1c6   :  { %2115 = vmatpush1.bf16.msra.mxu1 %v3821_v17 }
 0x1c7   :  { %2116 = vmatprep.subr.bf16.mxu1 %v3829_v26 }
 0x1c8   :  { %2860 = vmatpush1.bf16.msra.mxu0 %v3860_v20  ;;  %v3886_v20 = vld [vmem:[#allocation4 + $0x3a4] ss:$8 sps:$4 sm:$0xff]  }
 0x1c9   :  { %3715 = vmatmul.mubr.msk.bf16.gmra.mrb[48].mxu0 %vm945_vm4, %v976_v53 }
 0x1ca   :  { %3718 = vmatprep.mubr.msk.bf16.mxu0 %vm945_vm4, %v977_v57  ;;  %2117 = vmatpush1.bf16.msra.mxu1 %v3827_v6 }
 0x1cb   :  { %2118 = vmatprep.subr.bf16.mxu1 %v3835_v25 }
 0x1ce   :  { %2119 = vmatpush1.bf16.msra.mxu1 %v3833_v27 }
 0x1cf   :  { %2120 = vmatprep.subr.bf16.mxu1 %v3841_v19  ;;  %v3863_v19 = vld [vmem:[#allocation4 + $0x1e0] ss:$8 sps:$4 sm:$0xff]  }
 0x1d1   :  { %3719 = vmatmul.mubr.msk.bf16.gmra.mrb[52].mxu0 %vm945_vm4, %v1481_v7 }
 0x1d2   :  { %2121 = vmatpush1.bf16.msra.mxu1 %v3839_v28  ;;  %v3868_v28 = vld [vmem:[#allocation4 + $0x374] ss:$8 sps:$4 sm:$0xff]  }
 0x1d3   :  { %2122 = vmatprep.subr.bf16.mxu1 %v3847_v59  ;;  %2861 = vmatprep.subr.bf16.mxu0 %v3868_v28 }
 0x1d6   :  { %2123 = vmatpush1.bf16.msra.mxu1 %v3845_v61  ;;  %v3877_v61 = vld [vmem:[#allocation4 + $0x4] ss:$8 sps:$4 sm:$0xff]  }
 0x1d7   :  { %2124 = vmatprep.subr.bf16.mxu1 %v3853_v40 }
 0x1da   :  { %2125 = vmatpush1.bf16.msra.mxu1 %v3851_v41 }
 0x1db   :  { %2126 = vmatprep.subr.bf16.mxu1 %v3859_v13  ;;  %v3884_v13 = vld [vmem:[#allocation4 + $0x3a0] ss:$8 sps:$4 sm:$0xff]  }
 0x1de   :  { %2127 = vmatpush1.bf16.msra.mxu1 %v3857_v11 }
 0x1df   :  { %2128 = vmatprep.subr.bf16.mxu1 %v3865_v9 }
 0x1e2   :  { %2129 = vmatpush1.bf16.msra.mxu1 %v3863_v19 }
 0x26c   :  { %v3692_v30 = vpop.f32.mrb[24].mxu0 }
 0x26d   :  { %v1704_v32 = vadd.f32 %v3692_v30, %v4658_v29  ;;  %v1536_v33 = vpop.f32.mrb[25].mxu0 }
 0x26e   :  { %v1702_v35 = vadd.f32 %v4658_v29, %v1536_v33  ;;  %v3693_v36 = vpop.f32.mrb[26].mxu0 }
 0x26f   :  { %v1705_v31 = vadd.f32 %v3693_v36, %v4658_v29  ;;  %v1539_v37 = vpop.f32.mrb[27].mxu0  ;;  %v1736_v39 = vmax.f32 %v1704_v32, 0.0 }
 0x270   :  { %v1703_v38 = vadd.f32 %v4658_v29, %v1539_v37  ;;  %v1734_v42 = vmax.f32 %v1702_v35, 0.0 }
 0x271   :  { %v1737_v16 = vmax.f32 %v1705_v31, 0.0 }
 0x272   :  { %v1735_v8 = vmax.f32 %v1703_v38, 0.0  ;;  %v3866_v38 = vld [vmem:[#allocation4 + $0x370] ss:$8 sps:$4 sm:$0xff]  }
 0x273   :  { %v1767_v43 = vpack.c.bf16 %v1737_v16, %v1736_v39  ;;  %2862 = vmatpush1.bf16.msra.mxu0 %v3866_v38 }
 0x274   :  { %v1766_v44 = vpack.c.bf16 %v1735_v8, %v1734_v42  ;;  %v3696_v10 = vpop.f32.mrb[28].mxu0 }
 0x275   :  { %1784 = vst.msk [vmem:[#allocation3 + $0x8] sm:$0xff] %vm1782_vm5, %v1767_v43  ;;  %v1708_v45 = vadd.f32 %v3696_v10, %v4658_v29  ;;  %v1552_v46 = vpop.f32.mrb[29].mxu0  ;;  %v3871_v10 = vld [vmem:[#allocation4 + $0x1f4] ss:$8 sps:$4 sm:$0xff]  }
 0x276   :  { %1783 = vst.msk [vmem:[#allocation3] sm:$0xff] %vm1782_vm5, %v1766_v44  ;;  %v1706_v48 = vadd.f32 %v4658_v29, %v1552_v46  ;;  %v3697_v49 = vpop.f32.mrb[30].mxu0  ;;  %2130 = vmatprep.subr.bf16.mxu1 %v3871_v10 }
 0x277   :  { %v1709_v47 = vadd.f32 %v3697_v49, %v4658_v29  ;;  %v1555_v51 = vpop.f32.mrb[31].mxu0  ;;  %v1740_v54 = vmax.f32 %v1708_v45, 0.0 }
 0x278   :  { %v1707_v53 = vadd.f32 %v4658_v29, %v1555_v51  ;;  %v1738_v57 = vmax.f32 %v1706_v48, 0.0  ;;  %v3869_v48 = vld [vmem:[#allocation4 + $0x1f0] ss:$8 sps:$4 sm:$0xff]  }
 0x279   :  { %v1741_v52 = vmax.f32 %v1709_v47, 0.0  ;;  %2131 = vmatpush1.bf16.msra.mxu1 %v3869_v48  ;;  %v3904_v48 = vld [vmem:[#allocation4 + $0x3d4] ss:$8 sps:$4 sm:$0xff]  }
 0x27a   :  { %v1739_v58 = vmax.f32 %v1707_v53, 0.0  ;;  %2301 = vmatprep.subr.bf16.mxu1 %v3877_v61  ;;  %v3910_v61 = vld [vmem:[#allocation4 + $0x3e4] ss:$8 sps:$4 sm:$0xff]  }
 0x27b   :  { %v1769_v60 = vpack.c.bf16 %v1741_v52, %v1740_v54  ;;  %v3872_v54 = vld [vmem:[#allocation4 + $0x380] ss:$8 sps:$4 sm:$0xff]   ;;  %v3874_v52 = vld [vmem:[#allocation4 + $0x384] ss:$8 sps:$4 sm:$0xff]  }
 0x27c   :  { %v1768_v63 = vpack.c.bf16 %v1739_v58, %v1738_v57  ;;  %v3700_v7 = vpop.f32.mrb[32].mxu0  ;;  %v1806_v26 = vld [vmem:[#allocation3 + $0x8] sm:$0xf0]  ;;  %v1805_v44 = vld [vmem:[#allocation3 + $0x8] sm:$0xf]  ;;  %2863 = vmatprep.subr.bf16.mxu0 %v3874_v52 }
 0x27d   :  { %1786 = vst.msk [vmem:[#allocation3 + $0x18] sm:$0xff] %vm1782_vm5, %v1769_v60  ;;  %v1712_v34 = vadd.f32 %v3700_v7, %v4658_v29  ;;  %v1568_v55 = vpop.f32.mrb[33].mxu0  ;;  %v1808_v37 = vrot.slane %v1806_v26, 4  ;;  %2864 = vmatpush1.bf16.msra.mxu0 %v3872_v54  ;;  %v3880_v7 = vld [vmem:[#allocation4 + $0x394] ss:$8 sps:$4 sm:$0xff]  }
 0x27e   :  { %1785 = vst.msk [vmem:[#allocation3 + $0x10] sm:$0xff] %vm1782_vm5, %v1768_v63  ;;  %v1710_v3 = vadd.f32 %v4658_v29, %v1568_v55  ;;  %v3701_v21 = vpop.f32.mrb[34].mxu0  ;;  %2865 = vmatprep.subr.bf16.mxu0 %v3880_v7  ;;  %v3908_v7 = vld [vmem:[#allocation4 + $0x3e0] ss:$8 sps:$4 sm:$0xff]  }
 0x27f   :  { %v1713_v50 = vadd.f32 %v3701_v21, %v4658_v29  ;;  %v1571_v22 = vpop.f32.mrb[35].mxu0  ;;  %v1744_v5 = vmax.f32 %v1712_v34, 0.0  ;;  %v1810_v46 = vmax.bf16 %v1808_v37, %v1805_v44 }
 0x280   :  { %v1711_v12 = vadd.f32 %v4658_v29, %v1571_v22  ;;  %v1742_v4 = vmax.f32 %v1710_v3, 0.0  ;;  %v3878_v3 = vld [vmem:[#allocation4 + $0x390] ss:$8 sps:$4 sm:$0xff]  }
 0x281   :  { %v1745_v2 = vmax.f32 %v1713_v50, 0.0  ;;  %2866 = vmatpush1.bf16.msra.mxu0 %v3878_v3 }
 0x282   :  { %v1743_v62 = vmax.f32 %v1711_v12, 0.0  ;;  %2867 = vmatprep.subr.bf16.mxu0 %v3886_v20 }
 0x283   :  { %v1771_v18 = vpack.c.bf16 %v1745_v2, %v1744_v5 }
 0x284   :  { %v1770_v23 = vpack.c.bf16 %v1743_v62, %v1742_v4  ;;  %v3704_v24 = vpop.f32.mrb[36].mxu0  ;;  %v1818_v17 = vld [vmem:[#allocation3 + $0x18] sm:$0xf0]  ;;  %v1817_v33 = vld [vmem:[#allocation3 + $0x18] sm:$0xf] }
 0x285   :  { %1788 = vst.msk [vmem:[#allocation3 + $0x28] sm:$0xff] %vm1782_vm5, %v1771_v18  ;;  %v1716_v6 = vadd.f32 %v3704_v24, %v4658_v29  ;;  %v1584_v25 = vpop.f32.mrb[37].mxu0  ;;  %v1820_v27 = vrot.slane %v1818_v17, 4  ;;  %v3892_v17 = vld [vmem:[#allocation4 + $0x3b4] ss:$8 sps:$4 sm:$0xff]   ;;  %2868 = vmatpush1.bf16.msra.mxu0 %v3884_v13 }
 0x286   :  { %1787 = vst.msk [vmem:[#allocation3 + $0x20] sm:$0xff] %vm1782_vm5, %v1770_v23  ;;  %v1714_v30 = vadd.f32 %v4658_v29, %v1584_v25  ;;  %v3705_v32 = vpop.f32.mrb[38].mxu0  ;;  %2869 = vmatprep.subr.bf16.mxu0 %v3892_v17 }
 0x287   :  { %v1717_v35 = vadd.f32 %v3705_v32, %v4658_v29  ;;  %v1587_v36 = vpop.f32.mrb[39].mxu0  ;;  %v1822_v31 = vmax.bf16 %v1820_v27, %v1817_v33  ;;  %v1748_v16 = vmax.f32 %v1716_v6, 0.0  ;;  %v3890_v27 = vld [vmem:[#allocation4 + $0x3b0] ss:$8 sps:$4 sm:$0xff]  }
 0x288   :  { %v1715_v39 = vadd.f32 %v4658_v29, %v1587_v36  ;;  %v1746_v8 = vmax.f32 %v1714_v30, 0.0 }
 0x289   :  { %v1749_v42 = vmax.f32 %v1717_v35, 0.0  ;;  %1827 = vrot.lane.b32.xlu1 %v1822_v31, %s4060_s4  ;;  %2870 = vmatpush1.bf16.msra.mxu0 %v3890_v27 }
 0x28a   :  { %v1747_v43 = vmax.f32 %v1715_v39, 0.0 }
 0x28b   :  { %v1773_v45 = vpack.c.bf16 %v1749_v42, %v1748_v16  ;;  %v3896_v16 = vld [vmem:[#allocation4 + $0x3c0] ss:$8 sps:$4 sm:$0xff]   ;;  %v3898_v42 = vld [vmem:[#allocation4 + $0x3c4] ss:$8 sps:$4 sm:$0xff]  }
 0x28c   :  { %v1772_v49 = vpack.c.bf16 %v1747_v43, %v1746_v8  ;;  %v3708_v47 = vpop.f32.mrb[40].mxu0  ;;  %v1876_v41 = vld [vmem:[#allocation3 + $0x28] sm:$0xf0]  ;;  %v1875_v25 = vld [vmem:[#allocation3 + $0x28] sm:$0xf]  ;;  %2871 = vmatprep.subr.bf16.mxu0 %v3898_v42 }
 0x28d   :  { %1790 = vst.msk [vmem:[#allocation3 + $0x38] sm:$0xff] %vm1782_vm5, %v1773_v45  ;;  %v1720_v51 = vadd.f32 %v3708_v47, %v4658_v29  ;;  %1824 = vrot.lane.b32.xlu1 %v1810_v46, %s4060_s4  ;;  %v1600_v53 = vpop.f32.mrb[41].mxu0  ;;  %v1878_v18 = vrot.slane %v1876_v41, 4  ;;  %2872 = vmatpush1.bf16.msra.mxu0 %v3896_v16  ;;  %v3881_v16 = vld [vmem:[#allocation4 + $0x10] ss:$8 sps:$4 sm:$0xff]  }
 0x28e   :  { %1789 = vst.msk [vmem:[#allocation3 + $0x30] sm:$0xff] %vm1782_vm5, %v1772_v49  ;;  %v1718_v57 = vadd.f32 %v4658_v29, %v1600_v53  ;;  %v3709_v58 = vpop.f32.mrb[42].mxu0  ;;  %2873 = vmatprep.subr.bf16.mxu0 %v3904_v48  ;;  %v3889_v42 = vld [vmem:[#allocation4 + $0x24] ss:$8 sps:$4 sm:$0xff]  }
 0x28f   :  { %v1721_v59 = vadd.f32 %v3709_v58, %v4658_v29  ;;  %v1603_v60 = vpop.f32.mrb[43].mxu0  ;;  %v1752_v14 = vmax.f32 %v1720_v51, 0.0  ;;  %v1880_v28 = vmax.bf16 %v1878_v18, %v1875_v25  ;;  %v3902_v51 = vld [vmem:[#allocation4 + $0x3d0] ss:$8 sps:$4 sm:$0xff]  }
 0x290   :  { %v1719_v56 = vadd.f32 %v4658_v29, %v1603_v60  ;;  %v1750_v34 = vmax.f32 %v1718_v57, 0.0 }
 0x291   :  { %v1753_v63 = vmax.f32 %v1721_v59, 0.0  ;;  %2874 = vmatpush1.bf16.msra.mxu0 %v3902_v51 }
 0x292   :  { %v1751_v55 = vmax.f32 %v1719_v56, 0.0  ;;  %2875 = vmatprep.subr.bf16.mxu0 %v3910_v61 }
 0x293   :  { %v1775_v21 = vpack.c.bf16 %v1753_v63, %v1752_v14 }
 0x294   :  { %v1774_v40 = vpack.c.bf16 %v1751_v55, %v1750_v34  ;;  %v3712_v50 = vpop.f32.mrb[44].mxu0  ;;  %v1888_v22 = vld [vmem:[#allocation3 + $0x38] sm:$0xf0]  ;;  %v1887_v11 = vld [vmem:[#allocation3 + $0x38] sm:$0xf] }
 0x295   :  { %1792 = vst.msk [vmem:[#allocation3 + $0x48] sm:$0xff] %vm1782_vm5, %v1775_v21  ;;  %v1724_v12 = vadd.f32 %v3712_v50, %v4658_v29  ;;  %v1616_v0 = vpop.f32.mrb[45].mxu0  ;;  %v1890_v1 = vrot.slane %v1888_v22, 4  ;;  %v3916_v22 = vld [vmem:[#allocation4 + $0x3f4] ss:$8 sps:$4 sm:$0xff]   ;;  %2876 = vmatpush1.bf16.msra.mxu0 %v3908_v7 }
 0x296   :  { %1791 = vst.msk [vmem:[#allocation3 + $0x40] sm:$0xff] %vm1782_vm5, %v1774_v40  ;;  %v1722_v5 = vadd.f32 %v4658_v29, %v1616_v0  ;;  %v3713_v2 = vpop.f32.mrb[46].mxu0  ;;  %v3914_v0 = vld [vmem:[#allocation4 + $0x3f0] ss:$8 sps:$4 sm:$0xff]   ;;  %2877 = vmatprep.subr.bf16.mxu0 %v3916_v22  ;;  %v1882_v20 = vld [vmem:[#allocation3 + $0x30] sm:$0xf0] }
 0x297   :  { %v1725_v4 = vadd.f32 %v3713_v2, %v4658_v29  ;;  %v1619_v62 = vpop.f32.mrb[47].mxu0  ;;  %v1892_v15 = vmax.bf16 %v1890_v1, %v1887_v11  ;;  %v1756_v23 = vmax.f32 %v1724_v12, 0.0  ;;  %v1881_v17 = vld [vmem:[#allocation3 + $0x30] sm:$0xf]  ;;  %v3925_v22 = vld [vmem:[#allocation4 + $0x94] ss:$8 sps:$4 sm:$0xff]  }
 0x298   :  { %v1723_v9 = vadd.f32 %v4658_v29, %v1619_v62  ;;  %v1754_v26 = vmax.f32 %v1722_v5, 0.0 }
 0x299   :  { %v1757_v24 = vmax.f32 %v1725_v4, 0.0  ;;  %1897 = vrot.lane.b32.xlu0 %v1892_v15, %s4060_s4  ;;  %2878 = vmatpush1.bf16.msra.mxu0 %v3914_v0  ;;  %v3926_v0 = vld [vmem:[#allocation4 + $0xa0] ss:$8 sps:$4 sm:$0xff]  }
 0x29a   :  { %v1755_v6 = vmax.f32 %v1723_v9, 0.0  ;;  %v1884_v9 = vrot.slane %v1882_v20, 4 }
 0x29b   :  { %v1777_v19 = vpack.c.bf16 %v1757_v24, %v1756_v23  ;;  %v1870_v23 = vld [vmem:[#allocation3 + $0x20] sm:$0xf0]  ;;  %v1812_v24 = vld [vmem:[#allocation3 + $0x10] sm:$0xf0] }
 0x29c   :  { %v1776_v30 = vpack.c.bf16 %v1755_v6, %v1754_v26  ;;  %v3716_v32 = vpop.f32.mrb[48].mxu0  ;;  %v2349_v33 = vld [vmem:[#allocation3 + $0x48] sm:$0xf0]  ;;  %v2348_v31 = vld [vmem:[#allocation3 + $0x48] sm:$0xf]  ;;  %v1886_v26 = vmax.bf16 %v1884_v9, %v1881_v17  ;;  %v1872_v6 = vrot.slane %v1870_v23, 4 }
 0x29d   :  { %1794 = vst.msk [vmem:[#allocation3 + $0x58] sm:$0xff] %vm1782_vm5, %v1777_v19  ;;  %v1728_v35 = vadd.f32 %v3716_v32, %v4658_v29  ;;  %1894 = vrot.lane.b32.xlu0 %v1880_v28, %s4060_s4  ;;  %v1632_v36 = vpop.f32.mrb[49].mxu0  ;;  %v2351_v37 = vrot.slane %v2349_v33, 4  ;;  %v1814_v27 = vrot.slane %v1812_v24, 4  ;;  %v1869_v28 = vld [vmem:[#allocation3 + $0x20] sm:$0xf] }
 0x29e   :  { %1793 = vst.msk [vmem:[#allocation3 + $0x50] sm:$0xff] %vm1782_vm5, %v1776_v30  ;;  %v1726_v38 = vadd.f32 %v4658_v29, %v1632_v36  ;;  %v3717_v39 = vpop.f32.mrb[50].mxu0  ;;  %v1874_v32 = vmax.bf16 %v1872_v6, %v1869_v28  ;;  %v3875_v33 = vld [vmem:[#allocation4] ss:$8 sps:$4 sm:$0xff]   ;;  %v3941_v23 = vld [vmem:[#allocation4 + $0xf0] ss:$8 sps:$4 sm:$0xff]  }
 0x29f   :  { %v1729_v8 = vadd.f32 %v3717_v39, %v4658_v29  ;;  %v1635_v43 = vpop.f32.mrb[51].mxu0  ;;  %v2353_v44 = vmax.bf16 %v2351_v37, %v2348_v31  ;;  %v1760_v45 = vmax.f32 %v1728_v35, 0.0  ;;  %v1811_v35 = vld [vmem:[#allocation3 + $0x10] sm:$0xf]  ;;  %v3883_v37 = vld [vmem:[#allocation4 + $0x14] ss:$8 sps:$4 sm:$0xff]  }
 0x2a0   :  { %v1727_v10 = vadd.f32 %v4658_v29, %v1635_v43  ;;  %v1758_v49 = vmax.f32 %v1726_v38, 0.0  ;;  %v1816_v31 = vmax.bf16 %v1814_v27, %v1811_v35  ;;  %v3895_v43 = vld [vmem:[#allocation4 + $0x34] ss:$8 sps:$4 sm:$0xff]   ;;  %v3946_v24 = vld [vmem:[#allocation4 + $0x204] ss:$8 sps:$4 sm:$0xff]  }
 0x2a1   :  { %v1761_v46 = vmax.f32 %v1729_v8, 0.0  ;;  %2367 = vrot.lane.b32.xlu1 %v2353_v44, %s4060_s4  ;;  %v3887_v8 = vld [vmem:[#allocation4 + $0x20] ss:$8 sps:$4 sm:$0xff]   ;;  %v3893_v44 = vld [vmem:[#allocation4 + $0x30] ss:$8 sps:$4 sm:$0xff]  }
 0x2a2   :  { %v1759_v47 = vmax.f32 %v1727_v10, 0.0  ;;  %v3901_v10 = vld [vmem:[#allocation4 + $0x44] ss:$8 sps:$4 sm:$0xff]   ;;  %v3949_v28 = vld [vmem:[#allocation4 + $0x214] ss:$8 sps:$4 sm:$0xff]  }
 0x2a3   :  { %v1779_v53 = vpack.c.bf16 %v1761_v46, %v1760_v45  ;;  %v3899_v45 = vld [vmem:[#allocation4 + $0x40] ss:$8 sps:$4 sm:$0xff]   ;;  %v3907_v46 = vld [vmem:[#allocation4 + $0x54] ss:$8 sps:$4 sm:$0xff]   ;;  %v3952_v35 = vld [vmem:[#allocation4 + $0x224] ss:$8 sps:$4 sm:$0xff]  }
 0x2a4   :  { %v1778_v54 = vpack.c.bf16 %v1759_v47, %v1758_v49  ;;  %v3720_v52 = vpop.f32.mrb[52].mxu0  ;;  %v2361_v57 = vld [vmem:[#allocation3 + $0x58] sm:$0xf0]  ;;  %v2360_v63 = vld [vmem:[#allocation3 + $0x58] sm:$0xf] }
 0x2a5   :  { %1796 = vst.msk [vmem:[#allocation3 + $0x68] sm:$0xff] %vm1782_vm5, %v1779_v53  ;;  %v1732_v58 = vadd.f32 %v3720_v52, %v4658_v29  ;;  %v1648_v59 = vpop.f32.mrb[53].mxu0  ;;  %v2363_v60 = vrot.slane %v2361_v57, 4  ;;  %v3905_v49 = vld [vmem:[#allocation4 + $0x50] ss:$8 sps:$4 sm:$0xff]  }
 0x2a6   :  { %1795 = vst.msk [vmem:[#allocation3 + $0x60] sm:$0xff] %vm1782_vm5, %v1778_v54  ;;  %v1730_v56 = vadd.f32 %v4658_v29, %v1648_v59  ;;  %v3721_v14 = vpop.f32.mrb[54].mxu0  ;;  %v3913_v47 = vld [vmem:[#allocation4 + $0x64] ss:$8 sps:$4 sm:$0xff]   ;;  %v3911_v52 = vld [vmem:[#allocation4 + $0x60] ss:$8 sps:$4 sm:$0xff]  }
 0x2a7   :  { %v1733_v34 = vadd.f32 %v3721_v14, %v4658_v29  ;;  %v1651_v55 = vpop.f32.mrb[55].mxu0  ;;  %v2365_v3 = vmax.bf16 %v2363_v60, %v2360_v63  ;;  %v1764_v40 = vmax.f32 %v1732_v58, 0.0  ;;  %v3919_v60 = vld [vmem:[#allocation4 + $0x74] ss:$8 sps:$4 sm:$0xff]   ;;  %v3917_v63 = vld [vmem:[#allocation4 + $0x70] ss:$8 sps:$4 sm:$0xff]  }
 0x2a8   :  { %v1731_v21 = vadd.f32 %v4658_v29, %v1651_v55  ;;  %v1762_v41 = vmax.f32 %v1730_v56, 0.0  ;;  %v2355_v20 = vld [vmem:[#allocation3 + $0x50] sm:$0xf0]  ;;  %v2354_v27 = vld [vmem:[#allocation3 + $0x50] sm:$0xf] }
 0x2a9   :  { %v1765_v50 = vmax.f32 %v1733_v34, 0.0  ;;  %2370 = vrot.lane.b32.xlu0 %v2365_v3, %s4060_s4  ;;  %v3922_v3 = vld [vmem:[#allocation4 + $0x84] ss:$8 sps:$4 sm:$0xff]   ;;  %v2357_v17 = vrot.slane %v2355_v20, 4  ;;  %v4005_v20 = vld [vmem:[%s4806_s7 + $0x30] sm:$0xff]  }
 0x2aa   :  { %v1763_v12 = vmax.f32 %v1731_v21, 0.0 }
 0x2ab   :  { %v1781_v1 = vpack.c.bf16 %v1765_v50, %v1764_v40  ;;  %v3920_v50 = vld [vmem:[#allocation4 + $0x80] ss:$8 sps:$4 sm:$0xff]  }
 0x2ac   :  { %v1780_v5 = vpack.c.bf16 %v1763_v12, %v1762_v41  ;;  %v2623_v2 = vld [vmem:[#allocation3 + $0x68] sm:$0xf0]  ;;  %v2622_v13 = vld [vmem:[#allocation3 + $0x68] sm:$0xf]  ;;  %v3923_v41 = vld [vmem:[#allocation4 + $0x90] ss:$8 sps:$4 sm:$0xff]  }
 0x2ad   :  { %1798 = vst.msk [vmem:[#allocation3 + $0x78] sm:$0xff] %vm1782_vm5, %v1781_v1  ;;  %v2625_v11 = vrot.slane %v2623_v2, 4  ;;  %v2617_v53 = vld [vmem:[#allocation3 + $0x60] sm:$0xf0]  ;;  %v2616_v14 = vld [vmem:[#allocation3 + $0x60] sm:$0xf] }
 0x2ae   :  { %1797 = vst.msk [vmem:[#allocation3 + $0x70] sm:$0xff] %vm1782_vm5, %v1780_v5  ;;  %v2619_v59 = vrot.slane %v2617_v53, 4  ;;  %v3928_v12 = vld [vmem:[#allocation4 + $0xa4] ss:$8 sps:$4 sm:$0xff]   ;;  %v3931_v1 = vld [vmem:[#allocation4 + $0xb4] ss:$8 sps:$4 sm:$0xff]  }
 0x2af   :  { %v2627_v29 = vmax.bf16 %v2625_v11, %v2622_v13  ;;  %v3929_v5 = vld [vmem:[#allocation4 + $0xb0] ss:$8 sps:$4 sm:$0xff]   ;;  %v3934_v2 = vld [vmem:[#allocation4 + $0xc4] ss:$8 sps:$4 sm:$0xff]   ;;  %v3932_v11 = vld [vmem:[#allocation4 + $0xc0] ss:$8 sps:$4 sm:$0xff]  }
 0x2b0   :  { %v2621_v34 = vmax.bf16 %v2619_v59, %v2616_v14  ;;  %v3937_v13 = vld [vmem:[#allocation4 + $0xd4] ss:$8 sps:$4 sm:$0xff]   ;;  %v2343_v14 = vld [vmem:[#allocation3 + $0x40] sm:$0xf0] }
 0x2b1   :  { %2641 = vrot.lane.b32.xlu1 %v2627_v29, %s4060_s4  ;;  %v3935_v29 = vld [vmem:[#allocation4 + $0xd0] ss:$8 sps:$4 sm:$0xff]   ;;  %v3979_v53 = vld [vmem:[#allocation4 + $0x2b4] ss:$8 sps:$4 sm:$0xff]  }
 0x2b2   :  { %v3985_v59 = vld [vmem:[#allocation4 + $0x2d4] ss:$8 sps:$4 sm:$0xff]  }
 0x2b4   :  { %v2635_v4 = vld [vmem:[#allocation3 + $0x78] sm:$0xf0]  ;;  %v2634_v15 = vld [vmem:[#allocation3 + $0x78] sm:$0xf] }
 0x2b5   :  { %v2637_v62 = vrot.slane %v2635_v4, 4  ;;  %v2629_v51 = vld [vmem:[#allocation3 + $0x70] sm:$0xf0]  ;;  %v2628_v61 = vld [vmem:[#allocation3 + $0x70] sm:$0xf] }
 0x2b6   :  { %v2631_v57 = vrot.slane %v2629_v51, 4  ;;  %v3940_v4 = vld [vmem:[#allocation4 + $0xe4] ss:$8 sps:$4 sm:$0xff]   ;;  %v3974_v51 = vld [vmem:[#allocation4 + $0x2a0] ss:$8 sps:$4 sm:$0xff]  }
 0x2b7   :  { %v2639_v18 = vmax.bf16 %v2637_v62, %v2634_v15  ;;  %v3938_v62 = vld [vmem:[#allocation4 + $0xe0] ss:$8 sps:$4 sm:$0xff]   ;;  %v1800_v15 = vld [vmem:[#allocation3] sm:$0xf0] }
 0x2b8   :  { %v2633_v7 = vmax.bf16 %v2631_v57, %v2628_v61  ;;  %v1802_v9 = vrot.slane %v1800_v15, 4  ;;  %v3982_v57 = vld [vmem:[#allocation4 + $0x2c4] ss:$8 sps:$4 sm:$0xff]  }
 0x2b9   :  { %2644 = vrot.lane.b32.xlu0 %v2639_v18, %s4060_s4  ;;  %v3943_v18 = vld [vmem:[#allocation4 + $0xf4] ss:$8 sps:$4 sm:$0xff]   ;;  %v3988_v61 = vld [vmem:[#allocation4 + $0x2e4] ss:$8 sps:$4 sm:$0xff]  }
 0x2fb   :  { %v1828_v30 = vpop.permute.xlu1 %1827 }
 0x2fc   :  { %v1835_v39 = vsel %vm1782_vm5, %v1816_v31, %v1828_v30  ;;  %v3955_v31 = vld [vmem:[#allocation4 + $0x234] ss:$8 sps:$4 sm:$0xff]  }
 0x2ff   :  { %v4719_v48 = vpop.permute.xlu1 %1824 }
 0x30b   :  { %v1898_v25 = vpop.permute.xlu0 %1897 }
 0x30c   :  { %v1905_v19 = vsel %vm1782_vm5, %v1886_v26, %v1898_v25  ;;  %v1799_v26 = vld [vmem:[#allocation3] sm:$0xf] }
 0x30d   :  { %2132 = vmatprep.mubr.bf16.mxu1 %v1905_v19  ;;  %v1804_v6 = vmax.bf16 %v1802_v9, %v1799_v26  ;;  %v3944_v25 = vld [vmem:[#allocation4 + $0x200] ss:$8 sps:$4 sm:$0xff]   ;;  %v2359_v19 = vmax.bf16 %v2357_v17, %v2354_v27 }
 0x30e   :  { %v4006_v9 = vld [vmem:[%s4806_s7 + $0x78] sm:$0xff]  }
 0x30f   :  { %v1895_v36 = vpop.permute.xlu0 %1894  ;;  %v1831_v30 = vsel %vm1782_vm5, %v1804_v6, %v4719_v48  ;;  %v3973_v48 = vld [vmem:[#allocation4 + $0x294] ss:$8 sps:$4 sm:$0xff]  }
 0x310   :  { %v1901_v38 = vsel %vm1782_vm5, %v1874_v32, %v1895_v36  ;;  %v3950_v36 = vld [vmem:[#allocation4 + $0x220] ss:$8 sps:$4 sm:$0xff]  }
 0x311   :  { %2133 = vmatmul.mubr.bf16.vlgmr.msra.gmra.mrb[40].mxu1 %v1901_v38  ;;  %v3958_v38 = vld [vmem:[#allocation4 + $0x244] ss:$8 sps:$4 sm:$0xff]  }
 0x312   :  { %2302 = vmatpush1.bf16.msra.mxu1 %v3875_v33  ;;  %2333 = vmatprep.mubr.bf16.mxu1 %v1835_v39  ;;  %v3947_v33 = vld [vmem:[#allocation4 + $0x210] ss:$8 sps:$4 sm:$0xff]   ;;  %v3956_v39 = vld [vmem:[#allocation4 + $0x240] ss:$8 sps:$4 sm:$0xff]  }
 0x313   :  { %2303 = vmatprep.subr.bf16.mxu1 %v3883_v37  ;;  %v4721_v54 = vpop.permute.xlu1 %2367  ;;  %v3953_v37 = vld [vmem:[#allocation4 + $0x230] ss:$8 sps:$4 sm:$0xff]  }
 0x316   :  { %2304 = vmatpush1.bf16.msra.mxu1 %v3881_v16  ;;  %v3961_v16 = vld [vmem:[#allocation4 + $0x254] ss:$8 sps:$4 sm:$0xff]  }
 0x317   :  { %2305 = vmatprep.subr.bf16.mxu1 %v3889_v42  ;;  %v3959_v42 = vld [vmem:[#allocation4 + $0x250] ss:$8 sps:$4 sm:$0xff]  }
 0x31a   :  { %2306 = vmatpush1.bf16.msra.mxu1 %v3887_v8  ;;  %v3964_v8 = vld [vmem:[#allocation4 + $0x264] ss:$8 sps:$4 sm:$0xff]  }
 0x31b   :  { %2307 = vmatprep.subr.bf16.mxu1 %v3895_v43  ;;  %v4723_v58 = vpop.permute.xlu0 %2370  ;;  %v3962_v43 = vld [vmem:[#allocation4 + $0x260] ss:$8 sps:$4 sm:$0xff]  }
 0x31c   :  { %v2378_v32 = vsel %vm1782_vm5, %v2359_v19, %v4723_v58  ;;  %v3980_v58 = vld [vmem:[#allocation4 + $0x2c0] ss:$8 sps:$4 sm:$0xff]  }
 0x31e   :  { %2308 = vmatpush1.bf16.msra.mxu1 %v3893_v44  ;;  %v3967_v44 = vld [vmem:[#allocation4 + $0x274] ss:$8 sps:$4 sm:$0xff]  }
 0x31f   :  { %2309 = vmatprep.subr.bf16.mxu1 %v3901_v10  ;;  %v3965_v10 = vld [vmem:[#allocation4 + $0x270] ss:$8 sps:$4 sm:$0xff]  }
 0x322   :  { %2310 = vmatpush1.bf16.msra.mxu1 %v3899_v45  ;;  %v3970_v45 = vld [vmem:[#allocation4 + $0x284] ss:$8 sps:$4 sm:$0xff]  }
 0x323   :  { %2311 = vmatprep.subr.bf16.mxu1 %v3907_v46  ;;  %v2642_v56 = vpop.permute.xlu1 %2641  ;;  %v3968_v46 = vld [vmem:[#allocation4 + $0x280] ss:$8 sps:$4 sm:$0xff]  }
 0x324   :  { %v2648_v40 = vsel %vm1782_vm5, %v2621_v34, %v2642_v56  ;;  %v3986_v56 = vld [vmem:[#allocation4 + $0x2e0] ss:$8 sps:$4 sm:$0xff]   ;;  %v3989_v34 = vld [vmem:[#allocation4 + $0x2f0] ss:$8 sps:$4 sm:$0xff]  }
 0x326   :  { %2312 = vmatpush1.bf16.msra.mxu1 %v3905_v49  ;;  %v3971_v49 = vld [vmem:[#allocation4 + $0x290] ss:$8 sps:$4 sm:$0xff]  }
 0x327   :  { %2313 = vmatprep.subr.bf16.mxu1 %v3913_v47  ;;  %v3976_v47 = vld [vmem:[#allocation4 + $0x2a4] ss:$8 sps:$4 sm:$0xff]  }
 0x32a   :  { %2314 = vmatpush1.bf16.msra.mxu1 %v3911_v52  ;;  %v3977_v52 = vld [vmem:[#allocation4 + $0x2b0] ss:$8 sps:$4 sm:$0xff]  }
 0x32b   :  { %v2645_v55 = vpop.permute.xlu0 %2644  ;;  %2315 = vmatprep.subr.bf16.mxu1 %v3919_v60  ;;  %v3983_v60 = vld [vmem:[#allocation4 + $0x2d0] ss:$8 sps:$4 sm:$0xff]  }
 0x32c   :  { %v2652_v21 = vsel %vm1782_vm5, %v2633_v7, %v2645_v55  ;;  %v2345_v7 = vrot.slane %v2343_v14, 4  ;;  %v2342_v55 = vld [vmem:[#allocation3 + $0x40] sm:$0xf] }
 0x32d   :  { %2879 = vmatprep.mubr.bf16.mxu0 %v2652_v21 }
 0x32e   :  { %2316 = vmatpush1.bf16.msra.mxu1 %v3917_v63  ;;  %2880 = vmatmul.mubr.bf16.vlgmr.msra.gmra.mrb[56].mxu0 %v2648_v40  ;;  %v3991_v63 = vld [vmem:[#allocation4 + $0x2f4] ss:$8 sps:$4 sm:$0xff]   ;;  %v3992_v40 = vld [vmem:[%s4806_s7 + $0x40] sm:$0xff]  }
 0x32f   :  { %2317 = vmatprep.subr.bf16.mxu1 %v3922_v3  ;;  %v2347_v3 = vmax.bf16 %v2345_v7, %v2342_v55 }
 0x331   :  { %v2374_v21 = vsel %vm1782_vm5, %v2347_v3, %v4721_v54  ;;  %v3996_v54 = vld [vmem:[%s4806_s7 + $0x50] sm:$0xff]  }
 0x332   :  { %2318 = vmatpush1.bf16.msra.mxu1 %v3920_v50  ;;  %v3993_v50 = vld [vmem:[%s4806_s7] sm:$0xff]  }
 0x333   :  { %2319 = vmatprep.subr.bf16.mxu1 %v3925_v22  ;;  %v3994_v22 = vld [vmem:[%s4806_s7 + $0x48] sm:$0xff]  }
 0x336   :  { %2320 = vmatpush1.bf16.msra.mxu1 %v3923_v41  ;;  %v3995_v41 = vld [vmem:[%s4806_s7 + $0x8] sm:$0xff]  }
 0x337   :  { %2321 = vmatprep.subr.bf16.mxu1 %v3928_v12  ;;  %v3997_v12 = vld [vmem:[%s4806_s7 + $0x10] sm:$0xff]  }
 0x33a   :  { %2322 = vmatpush1.bf16.msra.mxu1 %v3926_v0  ;;  %v3998_v0 = vld [vmem:[%s4806_s7 + $0x58] sm:$0xff]  }
 0x33b   :  { %2323 = vmatprep.subr.bf16.mxu1 %v3931_v1  ;;  %v3999_v1 = vld [vmem:[%s4806_s7 + $0x18] sm:$0xff]  }
 0x33e   :  { %2324 = vmatpush1.bf16.msra.mxu1 %v3929_v5  ;;  %v4000_v5 = vld [vmem:[%s4806_s7 + $0x60] sm:$0xff]  }
 0x33f   :  { %2325 = vmatprep.subr.bf16.mxu1 %v3934_v2  ;;  %v4001_v2 = vld [vmem:[%s4806_s7 + $0x20] sm:$0xff]  }
 0x342   :  { %2326 = vmatpush1.bf16.msra.mxu1 %v3932_v11 }
 0x343   :  { %2327 = vmatprep.subr.bf16.mxu1 %v3937_v13 }
 0x346   :  { %2328 = vmatpush1.bf16.msra.mxu1 %v3935_v29  ;;  %v4002_v29 = vld [vmem:[%s4806_s7 + $0x68] sm:$0xff]  }
 0x347   :  { %2329 = vmatprep.subr.bf16.mxu1 %v3940_v4 }
 0x34a   :  { %2330 = vmatpush1.bf16.msra.mxu1 %v3938_v62  ;;  %v4003_v62 = vld [vmem:[%s4806_s7 + $0x28] sm:$0xff]  }
 0x34b   :  { %2331 = vmatprep.subr.bf16.mxu1 %v3943_v18  ;;  %v4004_v18 = vld [vmem:[%s4806_s7 + $0x70] sm:$0xff]  }
 0x34e   :  { %2332 = vmatpush1.bf16.msra.mxu1 %v3941_v23  ;;  %v4007_v23 = vld [vmem:[%s4806_s7 + $0x38] sm:$0xff]  }
 0x34f   :  { %2573 = vmatprep.subr.bf16.mxu1 %v3946_v24 }
 0x351   :  { %2334 = vmatmul.mubr.bf16.vlgmr.msra.gmra.mrb[44].mxu1 %v1831_v30 }
 0x352   :  { %2574 = vmatpush1.bf16.msra.mxu1 %v3944_v25  ;;  %2605 = vmatprep.mubr.bf16.mxu1 %v2378_v32 }
 0x353   :  { %2575 = vmatprep.subr.bf16.mxu1 %v3949_v28 }
 0x356   :  { %2576 = vmatpush1.bf16.msra.mxu1 %v3947_v33  ;;  %v2892_v33 = vlaneseq }
 0x357   :  { %2577 = vmatprep.subr.bf16.mxu1 %v3952_v35 }
 0x358   :  { %v2893_v35 = vshrl.u32 %v2892_v33, 7 }
 0x35a   :  { %2578 = vmatpush1.bf16.msra.mxu1 %v3950_v36  ;;  %v2894_v36 = vsub.s32 0, %v2893_v35 }
 0x35b   :  { %2579 = vmatprep.subr.bf16.mxu1 %v3955_v31  ;;  %v2890_v31 = vld [vmem:[%s4805_s6] sm:$0x3] }
 0x35e   :  { %2580 = vmatpush1.bf16.msra.mxu1 %v3953_v37  ;;  %v2898_v37 = vsub.s32 1, %v2893_v35 }
 0x35f   :  { %2581 = vmatprep.subr.bf16.mxu1 %v3958_v38 }
 0x362   :  { %2582 = vmatpush1.bf16.msra.mxu1 %v3956_v39 }
 0x363   :  { %2583 = vmatprep.subr.bf16.mxu1 %v3961_v16  ;;  %v2895_v16 = vrot.slane %v2890_v31, %v2894_v36 }
 0x366   :  { %2584 = vmatpush1.bf16.msra.mxu1 %v3959_v42 }
 0x367   :  { %2585 = vmatprep.subr.bf16.mxu1 %v3964_v8 }
 0x36a   :  { %2586 = vmatpush1.bf16.msra.mxu1 %v3962_v43  ;;  %v2899_v43 = vrot.slane %v2890_v31, %v2898_v37 }
 0x36b   :  { %2587 = vmatprep.subr.bf16.mxu1 %v3967_v44 }
 0x36e   :  { %2588 = vmatpush1.bf16.msra.mxu1 %v3965_v10 }
 0x36f   :  { %2589 = vmatprep.subr.bf16.mxu1 %v3970_v45 }
 0x372   :  { %2590 = vmatpush1.bf16.msra.mxu1 %v3968_v46 }
 0x373   :  { %2591 = vmatprep.subr.bf16.mxu1 %v3973_v48 }
 0x376   :  { %2592 = vmatpush1.bf16.msra.mxu1 %v3971_v49 }
 0x377   :  { %2593 = vmatprep.subr.bf16.mxu1 %v3976_v47 }
 0x37a   :  { %2594 = vmatpush1.bf16.msra.mxu1 %v3974_v51 }
 0x37b   :  { %2595 = vmatprep.subr.bf16.mxu1 %v3979_v53 }
 0x37e   :  { %2596 = vmatpush1.bf16.msra.mxu1 %v3977_v52 }
 0x37f   :  { %2597 = vmatprep.subr.bf16.mxu1 %v3982_v57 }
 0x382   :  { %2598 = vmatpush1.bf16.msra.mxu1 %v3980_v58  ;;  %v3355_v58 = vld [vmem:[%s4807_s8] ss:$0 sm:$0xff] }
 0x383   :  { %2599 = vmatprep.subr.bf16.mxu1 %v3985_v59 }
 0x386   :  { %2600 = vmatpush1.bf16.msra.mxu1 %v3983_v60 }
 0x387   :  { %2601 = vmatprep.subr.bf16.mxu1 %v3988_v61 }
 0x38a   :  { %2602 = vmatpush1.bf16.msra.mxu1 %v3986_v56 }
 0x38b   :  { %2603 = vmatprep.subr.bf16.mxu1 %v3991_v63 }
 0x38e   :  { %2604 = vmatpush1.bf16.msra.mxu1 %v3989_v34 }
 0x38f   :  { %3492 = vmatprep.subr.bf16.mxu1 %v3992_v40 }
 0x391   :  { %2606 = vmatmul.mubr.bf16.vlgmr.msra.gmra.mrb[48].mxu1 %v2374_v21 }
 0x392   :  { %3493 = vmatpush3.bf16.msra.mxu1 %v3993_v50 }
 0x393   :  { %3494 = vmatprep.subr.bf16.mxu1 %v3994_v22 }
 0x396   :  { %3495 = vmatpush3.bf16.msra.mxu1 %v3995_v41 }
 0x397   :  { %3496 = vmatprep.subr.bf16.mxu1 %v3996_v54 }
 0x39a   :  { %3497 = vmatpush3.bf16.msra.mxu1 %v3997_v12 }
 0x39b   :  { %3498 = vmatprep.subr.bf16.mxu1 %v3998_v0 }
 0x39e   :  { %3499 = vmatpush3.bf16.msra.mxu1 %v3999_v1 }
 0x39f   :  { %3500 = vmatprep.subr.bf16.mxu1 %v4000_v5 }
 0x3a2   :  { %3501 = vmatpush3.bf16.msra.mxu1 %v4001_v2 }
 0x3a3   :  { %3502 = vmatprep.subr.bf16.mxu1 %v4002_v29 }
 0x3a6   :  { %3503 = vmatpush3.bf16.msra.mxu1 %v4003_v62 }
 0x3a7   :  { %3504 = vmatprep.subr.bf16.mxu1 %v4004_v18 }
 0x3aa   :  { %3505 = vmatpush3.bf16.msra.mxu1 %v4005_v20 }
 0x3ab   :  { %3506 = vmatprep.subr.bf16.mxu1 %v4006_v9 }
 0x3ae   :  { %3507 = vmatpush3.bf16.msra.mxu1 %v4007_v23 }
 0x3e4   :  { %v2134_v11 = vpop.f32.mrb[40].mxu1 }
 0x3e5   :  { %v2136_v13 = vpop.f32.mrb[41].mxu1 }
 0x3e6   :  { %v2138_v4 = vpop.f32.mrb[42].mxu1 }
 0x3e7   :  { %v2139_v15 = vpop.f32.mrb[43].mxu1 }
 0x401   :  { %v2881_v24 = vpop.f32.mrb[56].mxu0 }
 0x402   :  { %v2883_v17 = vpop.f32.mrb[57].mxu0 }
 0x403   :  { %v2885_v26 = vpop.f32.mrb[58].mxu0 }
 0x404   :  { %v2886_v6 = vpop.f32.mrb[59].mxu0 }
 0x424   :  { %v2335_v25 = vpop.f32.mrb[44].mxu1 }
 0x425   :  { %v2336_v27 = vadd.f32 %v2335_v25, %v2134_v11  ;;  %v2337_v19 = vpop.f32.mrb[45].mxu1 }
 0x426   :  { %v2338_v28 = vadd.f32 %v2337_v19, %v2136_v13  ;;  %v2339_v30 = vpop.f32.mrb[46].mxu1 }
 0x427   :  { %v2340_v32 = vpop.f32.mrb[47].mxu1 }
 0x464   :  { %v2607_v38 = vpop.f32.mrb[48].mxu1 }
 0x465   :  { %v2614_v39 = vadd.f32 %v2607_v38, %v2336_v27  ;;  %v2609_v42 = vpop.f32.mrb[49].mxu1 }
 0x466   :  { %v2615_v8 = vadd.f32 %v2609_v42, %v2338_v28  ;;  %v2611_v44 = vpop.f32.mrb[50].mxu1 }
 0x467   :  { %v2888_v10 = vadd.f32 %v2881_v24, %v2614_v39  ;;  %v2612_v45 = vpop.f32.mrb[51].mxu1 }
 0x468   :  { %v2889_v46 = vadd.f32 %v2883_v17, %v2615_v8 }
 0x469   :  { %v2902_v48 = vadd.f32 %v2895_v16, %v2888_v10 }
 0x46a   :  { %v2903_v49 = vadd.f32 %v2899_v43, %v2889_v46 }
 0x46b   :  { %v2904_v47 = vmax.f32 %v2902_v48, 0.0 }
 0x46c   :  { %v2905_v51 = vmax.f32 %v2903_v49, 0.0 }
 0x46d   :  { %v2906_v52 = vpack.c.bf16 %v2904_v47, %v2904_v47 }
 0x46e   :  { %v2907_v53 = vpack.c.bf16 %v2905_v51, %v2905_v51 }
 0x470   :  { %3075 = vmatprep.mubr.bf16.mxu1 %v2907_v53 }
 0x471   :  { %3076 = vmatmul.mubr.bf16.vlgmr.msra.gmra.mrb[52].mxu1 %v2906_v52 }
 0x544   :  { %v3508_v57 = vpop.f32.mrb[52].mxu1 }
 0x545   :  { %v3509_v59 = vpop.f32.mrb[53].mxu1 }
 0x546   :  { %v3510_v60 = vadd.f32 %v3509_v59, %v3508_v57  ;;  %v3511_v61 = vpop.f32.mrb[54].mxu1 }
 0x547   :  { %v3512_v56 = vpop.f32.mrb[55].mxu1 }
 0x548   :  { %v3078_v14 = vadd.f32 %v3510_v60, %v3355_v58 }
 0x54a   :  { %3083 = vst [vmem:[#allocation7] sm:$0xff] %v3078_v14 }
 0x54b   :  { %4041 = shalt.err (!%p4038_p12)
}
 0x54c   :  { %s4042_s8 = scalar_lea.hbm %s4808_s9, 128 }
 0x54d   :  { %p4043_p13 = scmp.ne.s32.totalorder %s4808_s9, %s4042_s8  ;;  %p4046_p0 = scmp.lt.u32.totalorder %s4042_s8, %s4808_s9 }
 0x54f   :  { %p4048_p1 = pnand %p4046_p0, %p4043_p13 }
 0x551   :  { %4051 = shalt.err (!%p4048_p1)
}
 0x552   :  { %3093 = dma.vmem_to_hbm [thread:$0]  %s3091_s13, 128, %s4808_s9, [#allocation6]  }
 0x553   :  { %4054 = dma.done.wait [#allocation6], 128  }
 0x554   :  { %4055 = vsyncadd [#allocation6], 4294967168 }
 0x555   :  { %3097 = vsyncpa [#allocation5], 1 }
 0x556   :  { %3098 = vsyncpa [#allocation6], 1 }

</bundles_post_ra>
